<compile_context>
chip_gen: v7x
topology: tpu7x:2x2x1
jax: 0.10.0
libtpu: 0.0.40
codegen_flags: <defaults>
</compile_context>

<pallas_src>
import math

import jax
import jax.numpy as jnp
from jax import lax
from jax.experimental import pallas as pl
from jax.experimental.pallas import tpu as pltpu

# ---- hyperparameters mirroring the PyTorch module ---------------------------
# TODO(synk): input_dim comes from 'weights_lstm/list_features.npy' in the
# original script; use a small synthetic value here.
INPUT_DIM = 8
D_MODEL   = 64
N_HEADS   = 4
N_LAYERS  = 2
DIM_FF    = 2048          # nn.TransformerEncoderLayer default dim_feedforward
HEAD_DIM  = D_MODEL // N_HEADS
EPS       = 1e-5          # LayerNorm eps (PyTorch default)
N_CLASSES = 3

BATCH = 2
SEQ   = 8
BS    = BATCH * SEQ


# ---- in-kernel helpers -------------------------------------------------------
def _layer_norm(x, w, b):
    mu = jnp.mean(x, axis=-1, keepdims=True)
    var = jnp.mean((x - mu) ** 2, axis=-1, keepdims=True)
    return (x - mu) * lax.rsqrt(var + EPS) * w + b


# ---- the Pallas kernel (one grid step == one encoder layer) ------------------
def transformer_kernel(x_ref,                      # (BS, INPUT_DIM)       f32
                       win_ref, bin_ref,           # (IN, D), (1, D)       f32
                       fcw_ref, fcb_ref,           # (D, 3), (1, 3)        f32
                       wq_ref, wk_ref, wv_ref,     # (1, D, D)             bf16
                       bq_ref, bk_ref, bv_ref,     # (1, 1, D)             f32
                       wo_ref, bo_ref,             # (1, D, D), (1, 1, D)
                       n1w_ref, n1b_ref,           # (1, 1, D) x2
                       w1_ref, b1_ref,             # (1, D, DFF), (1, 1, DFF)
                       w2_ref, b2_ref,             # (1, DFF, D), (1, 1, D)
                       n2w_ref, n2b_ref,           # (1, 1, D) x2
                       out_ref,                    # (B, 3)
                       h_ref):                     # scratch (BS, D) f32, resident
    l = pl.program_id(0)

    # input_linear, only on the first grid step.
    @pl.when(l == 0)
    def _():
        h_ref[...] = (jnp.dot(x_ref[...], win_ref[...],
                              preferred_element_type=jnp.float32) + bin_ref[...])

    h = h_ref[...]                                   # (BS, D) f32 residual stream
    hb = h.astype(jnp.bfloat16)

    # --- multi-head self attention -------------------------------------------
    q = jnp.dot(hb, wq_ref[0], preferred_element_type=jnp.float32) + bq_ref[0]
    k = jnp.dot(hb, wk_ref[0], preferred_element_type=jnp.float32) + bk_ref[0]
    v = jnp.dot(hb, wv_ref[0], preferred_element_type=jnp.float32) + bv_ref[0]

    q3 = q.reshape(BATCH, SEQ, D_MODEL)
    k3 = k.reshape(BATCH, SEQ, D_MODEL).astype(jnp.bfloat16)
    v3 = v.reshape(BATCH, SEQ, D_MODEL).astype(jnp.bfloat16)

    scale = 1.0 / math.sqrt(HEAD_DIM)
    head_outs = []
    for hh in range(N_HEADS):
        lo = hh * HEAD_DIM
        qh = q3[:, :, lo:lo + HEAD_DIM].astype(jnp.bfloat16)
        kh = k3[:, :, lo:lo + HEAD_DIM]
        vh = v3[:, :, lo:lo + HEAD_DIM]
        s = jnp.einsum('bqd,bkd->bqk', qh, kh,
                       preferred_element_type=jnp.float32)          # (B, S, S)
        s = s * scale
        s = s - jnp.max(s, axis=-1, keepdims=True)                  # stable softmax (f32)
        p = jnp.exp(s)
        p = p / jnp.sum(p, axis=-1, keepdims=True)
        oh = jnp.einsum('bqk,bkd->bqd', p.astype(jnp.bfloat16), vh,
                        preferred_element_type=jnp.float32)         # (B, S, hd)
        head_outs.append(oh)
    attn = jnp.concatenate(head_outs, axis=-1).reshape(BS, D_MODEL)  # (BS, D) f32

    attn_out = (jnp.dot(attn.astype(jnp.bfloat16), wo_ref[0],
                        preferred_element_type=jnp.float32) + bo_ref[0])
    h = _layer_norm(h + attn_out, n1w_ref[0], n1b_ref[0])            # f32

    # --- feed forward ----------------------------------------------------------
    ff = (jnp.dot(h.astype(jnp.bfloat16), w1_ref[0],
                  preferred_element_type=jnp.float32) + b1_ref[0])
    ff = jnp.maximum(ff, 0.0)                                        # relu
    ff = (jnp.dot(ff.astype(jnp.bfloat16), w2_ref[0],
                  preferred_element_type=jnp.float32) + b2_ref[0])
    h = _layer_norm(h + ff, n2w_ref[0], n2b_ref[0])
    h_ref[...] = h

    # classifier head on the last sequence position, only on the last layer.
    @pl.when(l == N_LAYERS - 1)
    def _():
        last = jnp.concatenate(
            [h[b * SEQ + SEQ - 1: b * SEQ + SEQ, :] for b in range(BATCH)],
            axis=0)                                                  # (B, D)
        out_ref[...] = (jnp.dot(last, fcw_ref[...],
                                preferred_element_type=jnp.float32) + fcb_ref[...])


# ---- wrapper -----------------------------------------------------------------
@jax.jit
def transformer_classifier(x, p):
    bf16 = jnp.bfloat16
    t = lambda w: jnp.transpose(w, (0, 2, 1))

    # Pre-transpose to (in, out) layout, split fused QKV, cast big weights bf16.
    wq = t(p['inw'][:, :D_MODEL, :]).astype(bf16)               # (L, D, D)
    wk = t(p['inw'][:, D_MODEL:2 * D_MODEL, :]).astype(bf16)
    wv = t(p['inw'][:, 2 * D_MODEL:, :]).astype(bf16)
    bq = p['inb'][:, :, :D_MODEL]
    bk = p['inb'][:, :, D_MODEL:2 * D_MODEL]
    bv = p['inb'][:, :, 2 * D_MODEL:]
    wo = t(p['outw']).astype(bf16)                              # (L, D, D)
    w1 = t(p['l1w']).astype(bf16)                               # (L, D, DFF)
    w2 = t(p['l2w']).astype(bf16)                               # (L, DFF, D)
    win = p['win'].T                                            # (IN, D) f32
    fcw = p['fcw'].T                                            # (D, 3)  f32
    x2 = x.reshape(BS, INPUT_DIM)

    def const_spec(shape):
        zeros = (0,) * len(shape)
        return pl.BlockSpec(shape, lambda l: zeros)

    def layer_spec(shape):
        zeros = (0,) * len(shape)
        return pl.BlockSpec((1,) + shape, lambda l: (l,) + zeros)

    in_specs = [
        const_spec((BS, INPUT_DIM)),                 # x2
        const_spec((INPUT_DIM, D_MODEL)),            # win
        const_spec((1, D_MODEL)),                    # bin
        const_spec((D_MODEL, N_CLASSES)),            # fcw
        const_spec((1, N_CLASSES)),                  # fcb
        layer_spec((D_MODEL, D_MODEL)),              # wq
        layer_spec((D_MODEL, D_MODEL)),              # wk
        layer_spec((D_MODEL, D_MODEL)),              # wv
        layer_spec((1, D_MODEL)),                    # bq
        layer_spec((1, D_MODEL)),                    # bk
        layer_spec((1, D_MODEL)),                    # bv
        layer_spec((D_MODEL, D_MODEL)),              # wo
        layer_spec((1, D_MODEL)),                    # bo
        layer_spec((1, D_MODEL)),                    # n1w
        layer_spec((1, D_MODEL)),                    # n1b
        layer_spec((D_MODEL, DIM_FF)),               # w1
        layer_spec((1, DIM_FF)),                     # b1
        layer_spec((DIM_FF, D_MODEL)),               # w2
        layer_spec((1, D_MODEL)),                    # b2
        layer_spec((1, D_MODEL)),                    # n2w
        layer_spec((1, D_MODEL)),                    # n2b
    ]

    grid_spec = pltpu.PrefetchScalarGridSpec(
        num_scalar_prefetch=0,
        grid=(N_LAYERS,),
        in_specs=in_specs,
        out_specs=pl.BlockSpec((BATCH, N_CLASSES), lambda l: (0, 0)),
        scratch_shapes=[pltpu.VMEM((BS, D_MODEL), jnp.float32)],
    )

    return pl.pallas_call(
        transformer_kernel,
        out_shape=jax.ShapeDtypeStruct((BATCH, N_CLASSES), jnp.float32),
        grid_spec=grid_spec,
        compiler_params=pltpu.CompilerParams(
            dimension_semantics=("arbitrary",)),
    )(x2, win, p['bin'], fcw, p['fcb'],
      wq, wk, wv, bq, bk, bv,
      wo, p['outb'], p['n1w'], p['n1b'],
      w1, p['l1b'], w2, p['l2b'], p['n2w'], p['n2b'])


# ---- deterministic parameter init (PyTorch (out, in) layout) ------------------
def init_params(key):
    ks = jax.random.split(key, 12)

    def w(k, shape, scale=0.05):
        return (scale * jax.random.normal(k, shape)).astype(jnp.float32)

    return dict(
        win=w(ks[0], (D_MODEL, INPUT_DIM)),
        bin=w(ks[1], (1, D_MODEL)),
        inw=w(ks[2], (N_LAYERS, 3 * D_MODEL, D_MODEL)),
        inb=w(ks[3], (N_LAYERS, 1, 3 * D_MODEL)),
        outw=w(ks[4], (N_LAYERS, D_MODEL, D_MODEL)),
        outb=w(ks[5], (N_LAYERS, 1, D_MODEL)),
        n1w=jnp.ones((N_LAYERS, 1, D_MODEL), jnp.float32),
        n1b=jnp.zeros((N_LAYERS, 1, D_MODEL), jnp.float32),
        l1w=w(ks[6], (N_LAYERS, DIM_FF, D_MODEL)),
        l1b=w(ks[7], (N_LAYERS, 1, DIM_FF)),
        l2w=w(ks[8], (N_LAYERS, D_MODEL, DIM_FF)),
        l2b=w(ks[9], (N_LAYERS, 1, D_MODEL)),
        n2w=jnp.ones((N_LAYERS, 1, D_MODEL), jnp.float32),
        n2b=jnp.zeros((N_LAYERS, 1, D_MODEL), jnp.float32),
        fcw=w(ks[10], (N_CLASSES, D_MODEL)),
        fcb=w(ks[11], (1, N_CLASSES)),
    )


# ---- pure-JAX f32 reference (PyTorch semantics, for sanity check) --------------
def reference_forward(x, p):
    def ln(t, w_, b_):
        mu = jnp.mean(t, axis=-1, keepdims=True)
        var = jnp.mean((t - mu) ** 2, axis=-1, keepdims=True)
        return (t - mu) / jnp.sqrt(var + EPS) * w_ + b_

    h = jnp.einsum('bsi,di->bsd', x, p['win']) + p['bin'][0]
    for l in range(N_LAYERS):
        qkv = jnp.einsum('bsd,ed->bse', h, p['inw'][l]) + p['inb'][l, 0]
        q, k, v = jnp.split(qkv, 3, axis=-1)
        heads = lambda t: t.reshape(BATCH, SEQ, N_HEADS, HEAD_DIM).transpose(0, 2, 1, 3)
        qh, kh, vh = heads(q), heads(k), heads(v)
        scores = jnp.einsum('bhqd,bhkd->bhqk', qh, kh) / (HEAD_DIM ** 0.5)
        attn = jax.nn.softmax(scores, axis=-1)
        o = jnp.einsum('bhqk,bhkd->bhqd', attn, vh)
        o = o.transpose(0, 2, 1, 3).reshape(BATCH, SEQ, D_MODEL)
        o = jnp.einsum('bsd,ed->bse', o, p['outw'][l]) + p['outb'][l, 0]
        h = ln(h + o, p['n1w'][l, 0], p['n1b'][l, 0])
        ff = jax.nn.relu(jnp.einsum('bsd,fd->bsf', h, p['l1w'][l]) + p['l1b'][l, 0])
        ff = jnp.einsum('bsf,df->bsd', ff, p['l2w'][l]) + p['l2b'][l, 0]
        h = ln(h + ff, p['n2w'][l, 0], p['n2b'][l, 0])
    return jnp.einsum('bd,cd->bc', h[:, -1, :], p['fcw']) + p['fcb'][0]


if __name__ == "__main__":
    key = jax.random.PRNGKey(0)
    k_x, k_p = jax.random.split(key)
    x = jax.random.normal(k_x, (BATCH, SEQ, INPUT_DIM), dtype=jnp.float32)
    params = init_params(k_p)

    out = transformer_classifier(x, params)
    out = jax.block_until_ready(out)

    ref = reference_forward(x, params)
    assert out.shape == (BATCH, N_CLASSES)
    # bf16 matmul operands in the kernel vs. an f32 reference -> looser tolerance.
    assert jnp.allclose(out, ref, atol=3e-2, rtol=3e-2), (out, ref)
    print("KERNEL_OK")
</pallas_src>

<mosaic_0001>
module attributes {stable_mosaic.version = 11 : i64} {
  func.func @transformer_kernel(%arg0: i32, %arg1: memref<16x8xf32, #tpu.memory_space<vmem>>, %arg2: memref<8x64xf32, #tpu.memory_space<vmem>>, %arg3: memref<1x64xf32, #tpu.memory_space<vmem>>, %arg4: memref<64x3xf32, #tpu.memory_space<vmem>>, %arg5: memref<1x3xf32, #tpu.memory_space<vmem>>, %arg6: memref<1x64x64xbf16, #tpu.memory_space<vmem>>, %arg7: memref<1x64x64xbf16, #tpu.memory_space<vmem>>, %arg8: memref<1x64x64xbf16, #tpu.memory_space<vmem>>, %arg9: memref<1x1x64xf32, #tpu.memory_space<vmem>>, %arg10: memref<1x1x64xf32, #tpu.memory_space<vmem>>, %arg11: memref<1x1x64xf32, #tpu.memory_space<vmem>>, %arg12: memref<1x64x64xbf16, #tpu.memory_space<vmem>>, %arg13: memref<1x1x64xf32, #tpu.memory_space<vmem>>, %arg14: memref<1x1x64xf32, #tpu.memory_space<vmem>>, %arg15: memref<1x1x64xf32, #tpu.memory_space<vmem>>, %arg16: memref<1x64x2048xbf16, #tpu.memory_space<vmem>>, %arg17: memref<1x1x2048xf32, #tpu.memory_space<vmem>>, %arg18: memref<1x2048x64xbf16, #tpu.memory_space<vmem>>, %arg19: memref<1x1x64xf32, #tpu.memory_space<vmem>>, %arg20: memref<1x1x64xf32, #tpu.memory_space<vmem>>, %arg21: memref<1x1x64xf32, #tpu.memory_space<vmem>>, %arg22: memref<2x3xf32, #tpu.memory_space<vmem>>, %arg23: memref<16x64xf32, #tpu.memory_space<vmem>>) attributes {dimension_semantics = [#tpu.dimension_semantics<arbitrary>], iteration_bounds = array<i64: 2>, scalar_prefetch = 0 : i64, scratch_operands = 1 : i64, tpu.core_type = #tpu.core_type<tc>, window_params = [{pipeline_mode = #tpu.pipeline_mode<synchronous>, transform_indices = @transform_0, window_bounds = array<i64: 16, 8>}, {pipeline_mode = #tpu.pipeline_mode<synchronous>, transform_indices = @transform_1, window_bounds = array<i64: 8, 64>}, {pipeline_mode = #tpu.pipeline_mode<synchronous>, transform_indices = @transform_2, window_bounds = array<i64: 1, 64>}, {pipeline_mode = #tpu.pipeline_mode<synchronous>, transform_indices = @transform_3, window_bounds = array<i64: 64, 3>}, {pipeline_mode = #tpu.pipeline_mode<synchronous>, transform_indices = @transform_4, window_bounds = array<i64: 1, 3>}, {transform_indices = @transform_5, window_bounds = array<i64: 1, 64, 64>}, {transform_indices = @transform_6, window_bounds = array<i64: 1, 64, 64>}, {transform_indices = @transform_7, window_bounds = array<i64: 1, 64, 64>}, {transform_indices = @transform_8, window_bounds = array<i64: 1, 1, 64>}, {transform_indices = @transform_9, window_bounds = array<i64: 1, 1, 64>}, {transform_indices = @transform_10, window_bounds = array<i64: 1, 1, 64>}, {transform_indices = @transform_11, window_bounds = array<i64: 1, 64, 64>}, {transform_indices = @transform_12, window_bounds = array<i64: 1, 1, 64>}, {transform_indices = @transform_13, window_bounds = array<i64: 1, 1, 64>}, {transform_indices = @transform_14, window_bounds = array<i64: 1, 1, 64>}, {transform_indices = @transform_15, window_bounds = array<i64: 1, 64, 2048>}, {transform_indices = @transform_16, window_bounds = array<i64: 1, 1, 2048>}, {transform_indices = @transform_17, window_bounds = array<i64: 1, 2048, 64>}, {transform_indices = @transform_18, window_bounds = array<i64: 1, 1, 64>}, {transform_indices = @transform_19, window_bounds = array<i64: 1, 1, 64>}, {transform_indices = @transform_20, window_bounds = array<i64: 1, 1, 64>}, {pipeline_mode = #tpu.pipeline_mode<synchronous>, transform_indices = @transform_21, window_bounds = array<i64: 2, 3>}]} {
    %c0_i32 = arith.constant 0 : i32
    %0 = arith.cmpi eq, %arg0, %c0_i32 : i32
    %1 = arith.extui %0 : i1 to i32
    %c0_i32_0 = arith.constant 0 : i32
    %2 = arith.cmpi ne, %1, %c0_i32_0 : i32
    scf.if %2 {
      %c0_89 = arith.constant 0 : index
      %c0_90 = arith.constant 0 : index
      %189 = vector.load %arg1[%c0_89, %c0_90] : memref<16x8xf32, #tpu.memory_space<vmem>>, vector<16x8xf32>
      %c0_91 = arith.constant 0 : index
      %c0_92 = arith.constant 0 : index
      %190 = vector.load %arg2[%c0_91, %c0_92] : memref<8x64xf32, #tpu.memory_space<vmem>>, vector<8x64xf32>
      %cst_93 = arith.constant dense<0.000000e+00> : vector<16x64xf32>
      %191 = tpu.matmul %189, %190, %cst_93 {dimension_numbers = #tpu.dot_dimension_numbers<[1], [0], [0], [1], [0, 0, 1, 1], [], []>} : vector<16x8xf32>, vector<8x64xf32>, vector<16x64xf32> -> vector<16x64xf32>
      %c0_94 = arith.constant 0 : index
      %c0_95 = arith.constant 0 : index
      %192 = vector.load %arg3[%c0_94, %c0_95] : memref<1x64xf32, #tpu.memory_space<vmem>>, vector<1x64xf32>
      %193 = vector.broadcast %192 : vector<1x64xf32> to vector<16x64xf32>
      %194 = arith.addf %191, %193 : vector<16x64xf32>
      %c0_96 = arith.constant 0 : index
      %c0_97 = arith.constant 0 : index
      %195 = vector.load %arg23[%c0_96, %c0_97] : memref<16x64xf32, #tpu.memory_space<vmem>>, vector<16x64xf32>
      tpu.vector_store %arg23[%c0_96, %c0_97], %194 {strides = array<i32>} : memref<16x64xf32, #tpu.memory_space<vmem>>, vector<16x64xf32>,
    } else {
    }
    %c0 = arith.constant 0 : index
    %c0_1 = arith.constant 0 : index
    %3 = vector.load %arg23[%c0, %c0_1] : memref<16x64xf32, #tpu.memory_space<vmem>>, vector<16x64xf32>
    %4 = arith.truncf %3 : vector<16x64xf32> to vector<16x64xbf16>
    %c0_2 = arith.constant 0 : index
    %c0_3 = arith.constant 0 : index
    %c0_4 = arith.constant 0 : index
    %5 = vector.load %arg6[%c0_2, %c0_3, %c0_4] : memref<1x64x64xbf16, #tpu.memory_space<vmem>>, vector<1x64x64xbf16>
    %6 = vector.shape_cast %5 : vector<1x64x64xbf16> to vector<64x64xbf16>
    %cst = arith.constant dense<0.000000e+00> : vector<16x64xf32>
    %7 = tpu.matmul %4, %6, %cst {dimension_numbers = #tpu.dot_dimension_numbers<[1], [0], [0], [1], [0, 0, 1, 1], [], []>} : vector<16x64xbf16>, vector<64x64xbf16>, vector<16x64xf32> -> vector<16x64xf32>
    %c0_5 = arith.constant 0 : index
    %c0_6 = arith.constant 0 : index
    %c0_7 = arith.constant 0 : index
    %8 = vector.load %arg9[%c0_5, %c0_6, %c0_7] : memref<1x1x64xf32, #tpu.memory_space<vmem>>, vector<1x1x64xf32>
    %9 = vector.shape_cast %8 : vector<1x1x64xf32> to vector<1x64xf32>
    %10 = vector.broadcast %9 : vector<1x64xf32> to vector<16x64xf32>
    %11 = arith.addf %7, %10 : vector<16x64xf32>
    %c0_8 = arith.constant 0 : index
    %c0_9 = arith.constant 0 : index
    %c0_10 = arith.constant 0 : index
    %12 = vector.load %arg7[%c0_8, %c0_9, %c0_10] : memref<1x64x64xbf16, #tpu.memory_space<vmem>>, vector<1x64x64xbf16>
    %13 = vector.shape_cast %12 : vector<1x64x64xbf16> to vector<64x64xbf16>
    %cst_11 = arith.constant dense<0.000000e+00> : vector<16x64xf32>
    %14 = tpu.matmul %4, %13, %cst_11 {dimension_numbers = #tpu.dot_dimension_numbers<[1], [0], [0], [1], [0, 0, 1, 1], [], []>} : vector<16x64xbf16>, vector<64x64xbf16>, vector<16x64xf32> -> vector<16x64xf32>
    %c0_12 = arith.constant 0 : index
    %c0_13 = arith.constant 0 : index
    %c0_14 = arith.constant 0 : index
    %15 = vector.load %arg10[%c0_12, %c0_13, %c0_14] : memref<1x1x64xf32, #tpu.memory_space<vmem>>, vector<1x1x64xf32>
    %16 = vector.shape_cast %15 : vector<1x1x64xf32> to vector<1x64xf32>
    %17 = vector.broadcast %16 : vector<1x64xf32> to vector<16x64xf32>
    %18 = arith.addf %14, %17 : vector<16x64xf32>
    %c0_15 = arith.constant 0 : index
    %c0_16 = arith.constant 0 : index
    %c0_17 = arith.constant 0 : index
    %19 = vector.load %arg8[%c0_15, %c0_16, %c0_17] : memref<1x64x64xbf16, #tpu.memory_space<vmem>>, vector<1x64x64xbf16>
    %20 = vector.shape_cast %19 : vector<1x64x64xbf16> to vector<64x64xbf16>
    %cst_18 = arith.constant dense<0.000000e+00> : vector<16x64xf32>
    %21 = tpu.matmul %4, %20, %cst_18 {dimension_numbers = #tpu.dot_dimension_numbers<[1], [0], [0], [1], [0, 0, 1, 1], [], []>} : vector<16x64xbf16>, vector<64x64xbf16>, vector<16x64xf32> -> vector<16x64xf32>
    %c0_19 = arith.constant 0 : index
    %c0_20 = arith.constant 0 : index
    %c0_21 = arith.constant 0 : index
    %22 = vector.load %arg11[%c0_19, %c0_20, %c0_21] : memref<1x1x64xf32, #tpu.memory_space<vmem>>, vector<1x1x64xf32>
    %23 = vector.shape_cast %22 : vector<1x1x64xf32> to vector<1x64xf32>
    %24 = vector.broadcast %23 : vector<1x64xf32> to vector<16x64xf32>
    %25 = arith.addf %21, %24 : vector<16x64xf32>
    %26 = vector.shape_cast %11 : vector<16x64xf32> to vector<2x8x64xf32>
    %27 = vector.shape_cast %18 : vector<16x64xf32> to vector<2x8x64xf32>
    %28 = arith.truncf %27 : vector<2x8x64xf32> to vector<2x8x64xbf16>
    %29 = vector.shape_cast %25 : vector<16x64xf32> to vector<2x8x64xf32>
    %30 = arith.truncf %29 : vector<2x8x64xf32> to vector<2x8x64xbf16>
    %31 = vector.extract_strided_slice %26 {offsets = [0, 0, 0], sizes = [2, 8, 16], strides = [1, 1, 1]} : vector<2x8x64xf32> to vector<2x8x16xf32>
    %32 = arith.truncf %31 : vector<2x8x16xf32> to vector<2x8x16xbf16>
    %33 = vector.extract_strided_slice %28 {offsets = [0, 0, 0], sizes = [2, 8, 16], strides = [1, 1, 1]} : vector<2x8x64xbf16> to vector<2x8x16xbf16>
    %34 = vector.extract_strided_slice %30 {offsets = [0, 0, 0], sizes = [2, 8, 16], strides = [1, 1, 1]} : vector<2x8x64xbf16> to vector<2x8x16xbf16>
    "tpu.trace_start"() <{level = 10 : i32, message = "bqd,bkd->bqk"}> : () -> ()
    %cst_22 = arith.constant dense<0.000000e+00> : vector<2x8x8xf32>
    %35 = tpu.matmul %32, %33, %cst_22 {dimension_numbers = #tpu.dot_dimension_numbers<[2], [2], [1], [1], [0, 0, 0, 1, 1, 1], [0], [0]>} : vector<2x8x16xbf16>, vector<2x8x16xbf16>, vector<2x8x8xf32> -> vector<2x8x8xf32>
    "tpu.trace_stop"() : () -> ()
    %cst_23 = arith.constant 2.500000e-01 : f32
    %36 = vector.broadcast %cst_23 : f32 to vector<2x8x8xf32>
    %37 = arith.mulf %35, %36 : vector<2x8x8xf32>
    %cst_24 = arith.constant dense<0xFF800000> : vector<2x8xf32>
    %38 = vector.multi_reduction <maximumf>, %37, %cst_24 [2] : vector<2x8x8xf32> to vector<2x8xf32>
    %39 = vector.shape_cast %38 : vector<2x8xf32> to vector<2x8x1xf32>
    %40 = vector.broadcast %39 : vector<2x8x1xf32> to vector<2x8x8xf32>
    %41 = arith.subf %37, %40 : vector<2x8x8xf32>
    %42 = math.exp %41 : vector<2x8x8xf32>
    %cst_25 = arith.constant dense<0.000000e+00> : vector<2x8xf32>
    %43 = vector.multi_reduction <add>, %42, %cst_25 [2] : vector<2x8x8xf32> to vector<2x8xf32>
    %44 = vector.shape_cast %43 : vector<2x8xf32> to vector<2x8x1xf32>
    %45 = vector.broadcast %44 : vector<2x8x1xf32> to vector<2x8x8xf32>
    %46 = arith.divf %42, %45 : vector<2x8x8xf32>
    %47 = arith.truncf %46 : vector<2x8x8xf32> to vector<2x8x8xbf16>
    "tpu.trace_start"() <{level = 10 : i32, message = "bqk,bkd->bqd"}> : () -> ()
    %cst_26 = arith.constant dense<0.000000e+00> : vector<2x8x16xf32>
    %48 = tpu.matmul %47, %34, %cst_26 {dimension_numbers = #tpu.dot_dimension_numbers<[2], [1], [1], [2], [0, 0, 0, 1, 1, 2], [0], [0]>} : vector<2x8x8xbf16>, vector<2x8x16xbf16>, vector<2x8x16xf32> -> vector<2x8x16xf32>
    "tpu.trace_stop"() : () -> ()
    %49 = vector.extract_strided_slice %26 {offsets = [0, 0, 16], sizes = [2, 8, 16], strides = [1, 1, 1]} : vector<2x8x64xf32> to vector<2x8x16xf32>
    %50 = arith.truncf %49 : vector<2x8x16xf32> to vector<2x8x16xbf16>
    %51 = vector.extract_strided_slice %28 {offsets = [0, 0, 16], sizes = [2, 8, 16], strides = [1, 1, 1]} : vector<2x8x64xbf16> to vector<2x8x16xbf16>
    %52 = vector.extract_strided_slice %30 {offsets = [0, 0, 16], sizes = [2, 8, 16], strides = [1, 1, 1]} : vector<2x8x64xbf16> to vector<2x8x16xbf16>
    "tpu.trace_start"() <{level = 10 : i32, message = "bqd,bkd->bqk"}> : () -> ()
    %cst_27 = arith.constant dense<0.000000e+00> : vector<2x8x8xf32>
    %53 = tpu.matmul %50, %51, %cst_27 {dimension_numbers = #tpu.dot_dimension_numbers<[2], [2], [1], [1], [0, 0, 0, 1, 1, 1], [0], [0]>} : vector<2x8x16xbf16>, vector<2x8x16xbf16>, vector<2x8x8xf32> -> vector<2x8x8xf32>
    "tpu.trace_stop"() : () -> ()
    %cst_28 = arith.constant 2.500000e-01 : f32
    %54 = vector.broadcast %cst_28 : f32 to vector<2x8x8xf32>
    %55 = arith.mulf %53, %54 : vector<2x8x8xf32>
    %cst_29 = arith.constant dense<0xFF800000> : vector<2x8xf32>
    %56 = vector.multi_reduction <maximumf>, %55, %cst_29 [2] : vector<2x8x8xf32> to vector<2x8xf32>
    %57 = vector.shape_cast %56 : vector<2x8xf32> to vector<2x8x1xf32>
    %58 = vector.broadcast %57 : vector<2x8x1xf32> to vector<2x8x8xf32>
    %59 = arith.subf %55, %58 : vector<2x8x8xf32>
    %60 = math.exp %59 : vector<2x8x8xf32>
    %cst_30 = arith.constant dense<0.000000e+00> : vector<2x8xf32>
    %61 = vector.multi_reduction <add>, %60, %cst_30 [2] : vector<2x8x8xf32> to vector<2x8xf32>
    %62 = vector.shape_cast %61 : vector<2x8xf32> to vector<2x8x1xf32>
    %63 = vector.broadcast %62 : vector<2x8x1xf32> to vector<2x8x8xf32>
    %64 = arith.divf %60, %63 : vector<2x8x8xf32>
    %65 = arith.truncf %64 : vector<2x8x8xf32> to vector<2x8x8xbf16>
    "tpu.trace_start"() <{level = 10 : i32, message = "bqk,bkd->bqd"}> : () -> ()
    %cst_31 = arith.constant dense<0.000000e+00> : vector<2x8x16xf32>
    %66 = tpu.matmul %65, %52, %cst_31 {dimension_numbers = #tpu.dot_dimension_numbers<[2], [1], [1], [2], [0, 0, 0, 1, 1, 2], [0], [0]>} : vector<2x8x8xbf16>, vector<2x8x16xbf16>, vector<2x8x16xf32> -> vector<2x8x16xf32>
    "tpu.trace_stop"() : () -> ()
    %67 = vector.extract_strided_slice %26 {offsets = [0, 0, 32], sizes = [2, 8, 16], strides = [1, 1, 1]} : vector<2x8x64xf32> to vector<2x8x16xf32>
    %68 = arith.truncf %67 : vector<2x8x16xf32> to vector<2x8x16xbf16>
    %69 = vector.extract_strided_slice %28 {offsets = [0, 0, 32], sizes = [2, 8, 16], strides = [1, 1, 1]} : vector<2x8x64xbf16> to vector<2x8x16xbf16>
    %70 = vector.extract_strided_slice %30 {offsets = [0, 0, 32], sizes = [2, 8, 16], strides = [1, 1, 1]} : vector<2x8x64xbf16> to vector<2x8x16xbf16>
    "tpu.trace_start"() <{level = 10 : i32, message = "bqd,bkd->bqk"}> : () -> ()
    %cst_32 = arith.constant dense<0.000000e+00> : vector<2x8x8xf32>
    %71 = tpu.matmul %68, %69, %cst_32 {dimension_numbers = #tpu.dot_dimension_numbers<[2], [2], [1], [1], [0, 0, 0, 1, 1, 1], [0], [0]>} : vector<2x8x16xbf16>, vector<2x8x16xbf16>, vector<2x8x8xf32> -> vector<2x8x8xf32>
    "tpu.trace_stop"() : () -> ()
    %cst_33 = arith.constant 2.500000e-01 : f32
    %72 = vector.broadcast %cst_33 : f32 to vector<2x8x8xf32>
    %73 = arith.mulf %71, %72 : vector<2x8x8xf32>
    %cst_34 = arith.constant dense<0xFF800000> : vector<2x8xf32>
    %74 = vector.multi_reduction <maximumf>, %73, %cst_34 [2] : vector<2x8x8xf32> to vector<2x8xf32>
    %75 = vector.shape_cast %74 : vector<2x8xf32> to vector<2x8x1xf32>
    %76 = vector.broadcast %75 : vector<2x8x1xf32> to vector<2x8x8xf32>
    %77 = arith.subf %73, %76 : vector<2x8x8xf32>
    %78 = math.exp %77 : vector<2x8x8xf32>
    %cst_35 = arith.constant dense<0.000000e+00> : vector<2x8xf32>
    %79 = vector.multi_reduction <add>, %78, %cst_35 [2] : vector<2x8x8xf32> to vector<2x8xf32>
    %80 = vector.shape_cast %79 : vector<2x8xf32> to vector<2x8x1xf32>
    %81 = vector.broadcast %80 : vector<2x8x1xf32> to vector<2x8x8xf32>
    %82 = arith.divf %78, %81 : vector<2x8x8xf32>
    %83 = arith.truncf %82 : vector<2x8x8xf32> to vector<2x8x8xbf16>
    "tpu.trace_start"() <{level = 10 : i32, message = "bqk,bkd->bqd"}> : () -> ()
    %cst_36 = arith.constant dense<0.000000e+00> : vector<2x8x16xf32>
    %84 = tpu.matmul %83, %70, %cst_36 {dimension_numbers = #tpu.dot_dimension_numbers<[2], [1], [1], [2], [0, 0, 0, 1, 1, 2], [0], [0]>} : vector<2x8x8xbf16>, vector<2x8x16xbf16>, vector<2x8x16xf32> -> vector<2x8x16xf32>
    "tpu.trace_stop"() : () -> ()
    %85 = vector.extract_strided_slice %26 {offsets = [0, 0, 48], sizes = [2, 8, 16], strides = [1, 1, 1]} : vector<2x8x64xf32> to vector<2x8x16xf32>
    %86 = arith.truncf %85 : vector<2x8x16xf32> to vector<2x8x16xbf16>
    %87 = vector.extract_strided_slice %28 {offsets = [0, 0, 48], sizes = [2, 8, 16], strides = [1, 1, 1]} : vector<2x8x64xbf16> to vector<2x8x16xbf16>
    %88 = vector.extract_strided_slice %30 {offsets = [0, 0, 48], sizes = [2, 8, 16], strides = [1, 1, 1]} : vector<2x8x64xbf16> to vector<2x8x16xbf16>
    "tpu.trace_start"() <{level = 10 : i32, message = "bqd,bkd->bqk"}> : () -> ()
    %cst_37 = arith.constant dense<0.000000e+00> : vector<2x8x8xf32>
    %89 = tpu.matmul %86, %87, %cst_37 {dimension_numbers = #tpu.dot_dimension_numbers<[2], [2], [1], [1], [0, 0, 0, 1, 1, 1], [0], [0]>} : vector<2x8x16xbf16>, vector<2x8x16xbf16>, vector<2x8x8xf32> -> vector<2x8x8xf32>
    "tpu.trace_stop"() : () -> ()
    %cst_38 = arith.constant 2.500000e-01 : f32
    %90 = vector.broadcast %cst_38 : f32 to vector<2x8x8xf32>
    %91 = arith.mulf %89, %90 : vector<2x8x8xf32>
    %cst_39 = arith.constant dense<0xFF800000> : vector<2x8xf32>
    %92 = vector.multi_reduction <maximumf>, %91, %cst_39 [2] : vector<2x8x8xf32> to vector<2x8xf32>
    %93 = vector.shape_cast %92 : vector<2x8xf32> to vector<2x8x1xf32>
    %94 = vector.broadcast %93 : vector<2x8x1xf32> to vector<2x8x8xf32>
    %95 = arith.subf %91, %94 : vector<2x8x8xf32>
    %96 = math.exp %95 : vector<2x8x8xf32>
    %cst_40 = arith.constant dense<0.000000e+00> : vector<2x8xf32>
    %97 = vector.multi_reduction <add>, %96, %cst_40 [2] : vector<2x8x8xf32> to vector<2x8xf32>
    %98 = vector.shape_cast %97 : vector<2x8xf32> to vector<2x8x1xf32>
    %99 = vector.broadcast %98 : vector<2x8x1xf32> to vector<2x8x8xf32>
    %100 = arith.divf %96, %99 : vector<2x8x8xf32>
    %101 = arith.truncf %100 : vector<2x8x8xf32> to vector<2x8x8xbf16>
    "tpu.trace_start"() <{level = 10 : i32, message = "bqk,bkd->bqd"}> : () -> ()
    %cst_41 = arith.constant dense<0.000000e+00> : vector<2x8x16xf32>
    %102 = tpu.matmul %101, %88, %cst_41 {dimension_numbers = #tpu.dot_dimension_numbers<[2], [1], [1], [2], [0, 0, 0, 1, 1, 2], [0], [0]>} : vector<2x8x8xbf16>, vector<2x8x16xbf16>, vector<2x8x16xf32> -> vector<2x8x16xf32>
    "tpu.trace_stop"() : () -> ()
    %103 = tpu.concatenate %48, %66, %84, %102 in 2 : vector<2x8x16xf32>, vector<2x8x16xf32>, vector<2x8x16xf32>, vector<2x8x16xf32> -> vector<2x8x64xf32>
    %104 = vector.shape_cast %103 : vector<2x8x64xf32> to vector<16x64xf32>
    %105 = arith.truncf %104 : vector<16x64xf32> to vector<16x64xbf16>
    %c0_42 = arith.constant 0 : index
    %c0_43 = arith.constant 0 : index
    %c0_44 = arith.constant 0 : index
    %106 = vector.load %arg12[%c0_42, %c0_43, %c0_44] : memref<1x64x64xbf16, #tpu.memory_space<vmem>>, vector<1x64x64xbf16>
    %107 = vector.shape_cast %106 : vector<1x64x64xbf16> to vector<64x64xbf16>
    %cst_45 = arith.constant dense<0.000000e+00> : vector<16x64xf32>
    %108 = tpu.matmul %105, %107, %cst_45 {dimension_numbers = #tpu.dot_dimension_numbers<[1], [0], [0], [1], [0, 0, 1, 1], [], []>} : vector<16x64xbf16>, vector<64x64xbf16>, vector<16x64xf32> -> vector<16x64xf32>
    %c0_46 = arith.constant 0 : index
    %c0_47 = arith.constant 0 : index
    %c0_48 = arith.constant 0 : index
    %109 = vector.load %arg13[%c0_46, %c0_47, %c0_48] : memref<1x1x64xf32, #tpu.memory_space<vmem>>, vector<1x1x64xf32>
    %110 = vector.shape_cast %109 : vector<1x1x64xf32> to vector<1x64xf32>
    %111 = vector.broadcast %110 : vector<1x64xf32> to vector<16x64xf32>
    %112 = arith.addf %108, %111 : vector<16x64xf32>
    %113 = arith.addf %3, %112 : vector<16x64xf32>
    %c0_49 = arith.constant 0 : index
    %c0_50 = arith.constant 0 : index
    %c0_51 = arith.constant 0 : index
    %114 = vector.load %arg14[%c0_49, %c0_50, %c0_51] : memref<1x1x64xf32, #tpu.memory_space<vmem>>, vector<1x1x64xf32>
    %115 = vector.shape_cast %114 : vector<1x1x64xf32> to vector<1x64xf32>
    %c0_52 = arith.constant 0 : index
    %c0_53 = arith.constant 0 : index
    %c0_54 = arith.constant 0 : index
    %116 = vector.load %arg15[%c0_52, %c0_53, %c0_54] : memref<1x1x64xf32, #tpu.memory_space<vmem>>, vector<1x1x64xf32>
    %117 = vector.shape_cast %116 : vector<1x1x64xf32> to vector<1x64xf32>
    %cst_55 = arith.constant dense<0.000000e+00> : vector<16xf32>
    %118 = vector.multi_reduction <add>, %113, %cst_55 [1] : vector<16x64xf32> to vector<16xf32>
    %119 = vector.shape_cast %118 : vector<16xf32> to vector<16x1xf32>
    %cst_56 = arith.constant 6.400000e+01 : f32
    %120 = vector.broadcast %cst_56 : f32 to vector<16x1xf32>
    %121 = arith.divf %119, %120 : vector<16x1xf32>
    %122 = vector.broadcast %121 : vector<16x1xf32> to vector<16x64xf32>
    %123 = arith.subf %113, %122 : vector<16x64xf32>
    %124 = arith.mulf %123, %123 : vector<16x64xf32>
    %cst_57 = arith.constant dense<0.000000e+00> : vector<16xf32>
    %125 = vector.multi_reduction <add>, %124, %cst_57 [1] : vector<16x64xf32> to vector<16xf32>
    %126 = vector.shape_cast %125 : vector<16xf32> to vector<16x1xf32>
    %cst_58 = arith.constant 6.400000e+01 : f32
    %127 = vector.broadcast %cst_58 : f32 to vector<16x1xf32>
    %128 = arith.divf %126, %127 : vector<16x1xf32>
    %129 = vector.broadcast %121 : vector<16x1xf32> to vector<16x64xf32>
    %130 = arith.subf %113, %129 : vector<16x64xf32>
    %cst_59 = arith.constant 9.99999974E-6 : f32
    %131 = vector.broadcast %cst_59 : f32 to vector<16x1xf32>
    %132 = arith.addf %128, %131 : vector<16x1xf32>
    %133 = math.rsqrt %132 : vector<16x1xf32>
    %134 = vector.broadcast %133 : vector<16x1xf32> to vector<16x64xf32>
    %135 = arith.mulf %130, %134 : vector<16x64xf32>
    %136 = vector.broadcast %115 : vector<1x64xf32> to vector<16x64xf32>
    %137 = arith.mulf %135, %136 : vector<16x64xf32>
    %138 = vector.broadcast %117 : vector<1x64xf32> to vector<16x64xf32>
    %139 = arith.addf %137, %138 : vector<16x64xf32>
    %140 = arith.truncf %139 : vector<16x64xf32> to vector<16x64xbf16>
    %c0_60 = arith.constant 0 : index
    %c0_61 = arith.constant 0 : index
    %c0_62 = arith.constant 0 : index
    %141 = vector.load %arg16[%c0_60, %c0_61, %c0_62] : memref<1x64x2048xbf16, #tpu.memory_space<vmem>>, vector<1x64x2048xbf16>
    %142 = vector.shape_cast %141 : vector<1x64x2048xbf16> to vector<64x2048xbf16>
    %cst_63 = arith.constant dense<0.000000e+00> : vector<16x2048xf32>
    %143 = tpu.matmul %140, %142, %cst_63 {dimension_numbers = #tpu.dot_dimension_numbers<[1], [0], [0], [1], [0, 0, 1, 1], [], []>} : vector<16x64xbf16>, vector<64x2048xbf16>, vector<16x2048xf32> -> vector<16x2048xf32>
    %c0_64 = arith.constant 0 : index
    %c0_65 = arith.constant 0 : index
    %c0_66 = arith.constant 0 : index
    %144 = vector.load %arg17[%c0_64, %c0_65, %c0_66] : memref<1x1x2048xf32, #tpu.memory_space<vmem>>, vector<1x1x2048xf32>
    %145 = vector.shape_cast %144 : vector<1x1x2048xf32> to vector<1x2048xf32>
    %146 = vector.broadcast %145 : vector<1x2048xf32> to vector<16x2048xf32>
    %147 = arith.addf %143, %146 : vector<16x2048xf32>
    %cst_67 = arith.constant 0.000000e+00 : f32
    %148 = vector.broadcast %cst_67 : f32 to vector<16x2048xf32>
    %149 = arith.maximumf %147, %148 : vector<16x2048xf32>
    %150 = arith.truncf %149 : vector<16x2048xf32> to vector<16x2048xbf16>
    %c0_68 = arith.constant 0 : index
    %c0_69 = arith.constant 0 : index
    %c0_70 = arith.constant 0 : index
    %151 = vector.load %arg18[%c0_68, %c0_69, %c0_70] : memref<1x2048x64xbf16, #tpu.memory_space<vmem>>, vector<1x2048x64xbf16>
    %152 = vector.shape_cast %151 : vector<1x2048x64xbf16> to vector<2048x64xbf16>
    %cst_71 = arith.constant dense<0.000000e+00> : vector<16x64xf32>
    %153 = tpu.matmul %150, %152, %cst_71 {dimension_numbers = #tpu.dot_dimension_numbers<[1], [0], [0], [1], [0, 0, 1, 1], [], []>} : vector<16x2048xbf16>, vector<2048x64xbf16>, vector<16x64xf32> -> vector<16x64xf32>
    %c0_72 = arith.constant 0 : index
    %c0_73 = arith.constant 0 : index
    %c0_74 = arith.constant 0 : index
    %154 = vector.load %arg19[%c0_72, %c0_73, %c0_74] : memref<1x1x64xf32, #tpu.memory_space<vmem>>, vector<1x1x64xf32>
    %155 = vector.shape_cast %154 : vector<1x1x64xf32> to vector<1x64xf32>
    %156 = vector.broadcast %155 : vector<1x64xf32> to vector<16x64xf32>
    %157 = arith.addf %153, %156 : vector<16x64xf32>
    %158 = arith.addf %139, %157 : vector<16x64xf32>
    %c0_75 = arith.constant 0 : index
    %c0_76 = arith.constant 0 : index
    %c0_77 = arith.constant 0 : index
    %159 = vector.load %arg20[%c0_75, %c0_76, %c0_77] : memref<1x1x64xf32, #tpu.memory_space<vmem>>, vector<1x1x64xf32>
    %160 = vector.shape_cast %159 : vector<1x1x64xf32> to vector<1x64xf32>
    %c0_78 = arith.constant 0 : index
    %c0_79 = arith.constant 0 : index
    %c0_80 = arith.constant 0 : index
    %161 = vector.load %arg21[%c0_78, %c0_79, %c0_80] : memref<1x1x64xf32, #tpu.memory_space<vmem>>, vector<1x1x64xf32>
    %162 = vector.shape_cast %161 : vector<1x1x64xf32> to vector<1x64xf32>
    %cst_81 = arith.constant dense<0.000000e+00> : vector<16xf32>
    %163 = vector.multi_reduction <add>, %158, %cst_81 [1] : vector<16x64xf32> to vector<16xf32>
    %164 = vector.shape_cast %163 : vector<16xf32> to vector<16x1xf32>
    %cst_82 = arith.constant 6.400000e+01 : f32
    %165 = vector.broadcast %cst_82 : f32 to vector<16x1xf32>
    %166 = arith.divf %164, %165 : vector<16x1xf32>
    %167 = vector.broadcast %166 : vector<16x1xf32> to vector<16x64xf32>
    %168 = arith.subf %158, %167 : vector<16x64xf32>
    %169 = arith.mulf %168, %168 : vector<16x64xf32>
    %cst_83 = arith.constant dense<0.000000e+00> : vector<16xf32>
    %170 = vector.multi_reduction <add>, %169, %cst_83 [1] : vector<16x64xf32> to vector<16xf32>
    %171 = vector.shape_cast %170 : vector<16xf32> to vector<16x1xf32>
    %cst_84 = arith.constant 6.400000e+01 : f32
    %172 = vector.broadcast %cst_84 : f32 to vector<16x1xf32>
    %173 = arith.divf %171, %172 : vector<16x1xf32>
    %174 = vector.broadcast %166 : vector<16x1xf32> to vector<16x64xf32>
    %175 = arith.subf %158, %174 : vector<16x64xf32>
    %cst_85 = arith.constant 9.99999974E-6 : f32
    %176 = vector.broadcast %cst_85 : f32 to vector<16x1xf32>
    %177 = arith.addf %173, %176 : vector<16x1xf32>
    %178 = math.rsqrt %177 : vector<16x1xf32>
    %179 = vector.broadcast %178 : vector<16x1xf32> to vector<16x64xf32>
    %180 = arith.mulf %175, %179 : vector<16x64xf32>
    %181 = vector.broadcast %160 : vector<1x64xf32> to vector<16x64xf32>
    %182 = arith.mulf %180, %181 : vector<16x64xf32>
    %183 = vector.broadcast %162 : vector<1x64xf32> to vector<16x64xf32>
    %184 = arith.addf %182, %183 : vector<16x64xf32>
    %c0_86 = arith.constant 0 : index
    %c0_87 = arith.constant 0 : index
    %185 = vector.load %arg23[%c0_86, %c0_87] : memref<16x64xf32, #tpu.memory_space<vmem>>, vector<16x64xf32>
    tpu.vector_store %arg23[%c0_86, %c0_87], %184 {strides = array<i32>} : memref<16x64xf32, #tpu.memory_space<vmem>>, vector<16x64xf32>,
    %c1_i32 = arith.constant 1 : i32
    %186 = arith.cmpi eq, %arg0, %c1_i32 : i32
    %187 = arith.extui %186 : i1 to i32
    %c0_i32_88 = arith.constant 0 : i32
    %188 = arith.cmpi ne, %187, %c0_i32_88 : i32
    scf.if %188 {
      %189 = vector.extract_strided_slice %184 {offsets = [7, 0], sizes = [1, 64], strides = [1, 1]} : vector<16x64xf32> to vector<1x64xf32>
      %190 = vector.extract_strided_slice %184 {offsets = [15, 0], sizes = [1, 64], strides = [1, 1]} : vector<16x64xf32> to vector<1x64xf32>
      %191 = tpu.concatenate %189, %190 in 0 : vector<1x64xf32>, vector<1x64xf32> -> vector<2x64xf32>
      %c0_89 = arith.constant 0 : index
      %c0_90 = arith.constant 0 : index
      %192 = vector.load %arg4[%c0_89, %c0_90] : memref<64x3xf32, #tpu.memory_space<vmem>>, vector<64x3xf32>
      %cst_91 = arith.constant dense<0.000000e+00> : vector<2x3xf32>
      %193 = tpu.matmul %191, %192, %cst_91 {dimension_numbers = #tpu.dot_dimension_numbers<[1], [0], [0], [1], [0, 0, 1, 1], [], []>} : vector<2x64xf32>, vector<64x3xf32>, vector<2x3xf32> -> vector<2x3xf32>
      %c0_92 = arith.constant 0 : index
      %c0_93 = arith.constant 0 : index
      %194 = vector.load %arg5[%c0_92, %c0_93] : memref<1x3xf32, #tpu.memory_space<vmem>>, vector<1x3xf32>
      %195 = vector.broadcast %194 : vector<1x3xf32> to vector<2x3xf32>
      %196 = arith.addf %193, %195 : vector<2x3xf32>
      %c0_94 = arith.constant 0 : index
      %c0_95 = arith.constant 0 : index
      %197 = vector.load %arg22[%c0_94, %c0_95] : memref<2x3xf32, #tpu.memory_space<vmem>>, vector<2x3xf32>
      tpu.vector_store %arg22[%c0_94, %c0_95], %196 {strides = array<i32>} : memref<2x3xf32, #tpu.memory_space<vmem>>, vector<2x3xf32>,
    } else {
    }
    return
  }
  func.func @transform_0(%arg0: i32) -> (i32, i32) {
    %c0_i32 = arith.constant 0 : i32
    %c0_i32_0 = arith.constant 0 : i32
    %c0_i32_1 = arith.constant 0 : i32
    return %c0_i32, %c0_i32_0 : i32, i32
  }
  func.func @transform_1(%arg0: i32) -> (i32, i32) {
    %c0_i32 = arith.constant 0 : i32
    %c0_i32_0 = arith.constant 0 : i32
    %c0_i32_1 = arith.constant 0 : i32
    return %c0_i32, %c0_i32_0 : i32, i32
  }
  func.func @transform_2(%arg0: i32) -> (i32, i32) {
    %c0_i32 = arith.constant 0 : i32
    %c0_i32_0 = arith.constant 0 : i32
    %c0_i32_1 = arith.constant 0 : i32
    return %c0_i32, %c0_i32_0 : i32, i32
  }
  func.func @transform_3(%arg0: i32) -> (i32, i32) {
    %c0_i32 = arith.constant 0 : i32
    %c0_i32_0 = arith.constant 0 : i32
    %c0_i32_1 = arith.constant 0 : i32
    return %c0_i32, %c0_i32_0 : i32, i32
  }
  func.func @transform_4(%arg0: i32) -> (i32, i32) {
    %c0_i32 = arith.constant 0 : i32
    %c0_i32_0 = arith.constant 0 : i32
    %c0_i32_1 = arith.constant 0 : i32
    return %c0_i32, %c0_i32_0 : i32, i32
  }
  func.func @transform_5(%arg0: i32) -> (i32, i32, i32) {
    %c0_i32 = arith.constant 0 : i32
    %c0_i32_0 = arith.constant 0 : i32
    %c0_i32_1 = arith.constant 0 : i32
    return %arg0, %c0_i32, %c0_i32_0 : i32, i32, i32
  }
  func.func @transform_6(%arg0: i32) -> (i32, i32, i32) {
    %c0_i32 = arith.constant 0 : i32
    %c0_i32_0 = arith.constant 0 : i32
    %c0_i32_1 = arith.constant 0 : i32
    return %arg0, %c0_i32, %c0_i32_0 : i32, i32, i32
  }
  func.func @transform_7(%arg0: i32) -> (i32, i32, i32) {
    %c0_i32 = arith.constant 0 : i32
    %c0_i32_0 = arith.constant 0 : i32
    %c0_i32_1 = arith.constant 0 : i32
    return %arg0, %c0_i32, %c0_i32_0 : i32, i32, i32
  }
  func.func @transform_8(%arg0: i32) -> (i32, i32, i32) {
    %c0_i32 = arith.constant 0 : i32
    %c0_i32_0 = arith.constant 0 : i32
    %c0_i32_1 = arith.constant 0 : i32
    return %arg0, %c0_i32, %c0_i32_0 : i32, i32, i32
  }
  func.func @transform_9(%arg0: i32) -> (i32, i32, i32) {
    %c0_i32 = arith.constant 0 : i32
    %c0_i32_0 = arith.constant 0 : i32
    %c0_i32_1 = arith.constant 0 : i32
    return %arg0, %c0_i32, %c0_i32_0 : i32, i32, i32
  }
  func.func @transform_10(%arg0: i32) -> (i32, i32, i32) {
    %c0_i32 = arith.constant 0 : i32
    %c0_i32_0 = arith.constant 0 : i32
    %c0_i32_1 = arith.constant 0 : i32
    return %arg0, %c0_i32, %c0_i32_0 : i32, i32, i32
  }
  func.func @transform_11(%arg0: i32) -> (i32, i32, i32) {
    %c0_i32 = arith.constant 0 : i32
    %c0_i32_0 = arith.constant 0 : i32
    %c0_i32_1 = arith.constant 0 : i32
    return %arg0, %c0_i32, %c0_i32_0 : i32, i32, i32
  }
  func.func @transform_12(%arg0: i32) -> (i32, i32, i32) {
    %c0_i32 = arith.constant 0 : i32
    %c0_i32_0 = arith.constant 0 : i32
    %c0_i32_1 = arith.constant 0 : i32
    return %arg0, %c0_i32, %c0_i32_0 : i32, i32, i32
  }
  func.func @transform_13(%arg0: i32) -> (i32, i32, i32) {
    %c0_i32 = arith.constant 0 : i32
    %c0_i32_0 = arith.constant 0 : i32
    %c0_i32_1 = arith.constant 0 : i32
    return %arg0, %c0_i32, %c0_i32_0 : i32, i32, i32
  }
  func.func @transform_14(%arg0: i32) -> (i32, i32, i32) {
    %c0_i32 = arith.constant 0 : i32
    %c0_i32_0 = arith.constant 0 : i32
    %c0_i32_1 = arith.constant 0 : i32
    return %arg0, %c0_i32, %c0_i32_0 : i32, i32, i32
  }
  func.func @transform_15(%arg0: i32) -> (i32, i32, i32) {
    %c0_i32 = arith.constant 0 : i32
    %c0_i32_0 = arith.constant 0 : i32
    %c0_i32_1 = arith.constant 0 : i32
    return %arg0, %c0_i32, %c0_i32_0 : i32, i32, i32
  }
  func.func @transform_16(%arg0: i32) -> (i32, i32, i32) {
    %c0_i32 = arith.constant 0 : i32
    %c0_i32_0 = arith.constant 0 : i32
    %c0_i32_1 = arith.constant 0 : i32
    return %arg0, %c0_i32, %c0_i32_0 : i32, i32, i32
  }
  func.func @transform_17(%arg0: i32) -> (i32, i32, i32) {
    %c0_i32 = arith.constant 0 : i32
    %c0_i32_0 = arith.constant 0 : i32
    %c0_i32_1 = arith.constant 0 : i32
    return %arg0, %c0_i32, %c0_i32_0 : i32, i32, i32
  }
  func.func @transform_18(%arg0: i32) -> (i32, i32, i32) {
    %c0_i32 = arith.constant 0 : i32
    %c0_i32_0 = arith.constant 0 : i32
    %c0_i32_1 = arith.constant 0 : i32
    return %arg0, %c0_i32, %c0_i32_0 : i32, i32, i32
  }
  func.func @transform_19(%arg0: i32) -> (i32, i32, i32) {
    %c0_i32 = arith.constant 0 : i32
    %c0_i32_0 = arith.constant 0 : i32
    %c0_i32_1 = arith.constant 0 : i32
    return %arg0, %c0_i32, %c0_i32_0 : i32, i32, i32
  }
  func.func @transform_20(%arg0: i32) -> (i32, i32, i32) {
    %c0_i32 = arith.constant 0 : i32
    %c0_i32_0 = arith.constant 0 : i32
    %c0_i32_1 = arith.constant 0 : i32
    return %arg0, %c0_i32, %c0_i32_0 : i32, i32, i32
  }
  func.func @transform_21(%arg0: i32) -> (i32, i32) {
    %c0_i32 = arith.constant 0 : i32
    %c0_i32_0 = arith.constant 0 : i32
    %c0_i32_1 = arith.constant 0 : i32
    return %c0_i32, %c0_i32_0 : i32, i32
  }
}

</mosaic_0001>

<bundles_post_ra>
// kernel: transformer_classifier.1
= control target key start
LH: loop header
LB: loop body
LE: loop exit
PB: predicated region body
PF: predicated region fallthrough
CT: control target
= control target key end

     0   :  { %s6678_s0 = inlined_call_operand.vmem [shape: f32[16,8], index: 0, kind: input, shape index: {}]   ;;  %s6679_s1 = inlined_call_operand.vmem [shape: f32[8,64], index: 1, kind: input, shape index: {}]   ;;  %s6680_s2 = inlined_call_operand.vmem [shape: f32[1,64], index: 2, kind: input, shape index: {}]   ;;  %s6681_s3 = inlined_call_operand.vmem [shape: f32[64,3], index: 3, kind: input, shape index: {}]   ;;  %s6682_s4 = inlined_call_operand.vmem [shape: f32[1,3], index: 4, kind: input, shape index: {}]   ;;  %s6683_s5 = inlined_call_operand.vmem [shape: bf16[2,64,64], index: 5, kind: input, shape index: {}]   ;;  %s6684_s6 = inlined_call_operand.vmem [shape: bf16[2,64,64], index: 6, kind: input, shape index: {}]   ;;  %s6685_s7 = inlined_call_operand.vmem [shape: bf16[2,64,64], index: 7, kind: input, shape index: {}]   ;;  %s6686_s8 = inlined_call_operand.vmem [shape: f32[2,1,64], index: 8, kind: input, shape index: {}]   ;;  %s6687_s9 = inlined_call_operand.vmem [shape: f32[2,1,64], index: 9, kind: input, shape index: {}]   ;;  %s6688_s10 = inlined_call_operand.vmem [shape: f32[2,1,64], index: 10, kind: input, shape index: {}]   ;;  %s6689_s11 = inlined_call_operand.vmem [shape: bf16[2,64,64], index: 11, kind: input, shape index: {}]   ;;  %s6690_s12 = inlined_call_operand.vmem [shape: f32[2,1,64], index: 12, kind: input, shape index: {}]   ;;  %s6691_s13 = inlined_call_operand.vmem [shape: f32[2,1,64], index: 13, kind: input, shape index: {}]   ;;  %s6692_s14 = inlined_call_operand.vmem [shape: f32[2,1,64], index: 14, kind: input, shape index: {}]   ;;  %s6693_s15 = inlined_call_operand.vmem [shape: bf16[2,64,2048], index: 15, kind: input, shape index: {}]   ;;  %s6694_s16 = inlined_call_operand.vmem [shape: f32[2,1,2048], index: 16, kind: input, shape index: {}]   ;;  %s6695_s17 = inlined_call_operand.vmem [shape: bf16[2,2048,64], index: 17, kind: input, shape index: {}]   ;;  %s6696_s18 = inlined_call_operand.vmem [shape: f32[2,1,64], index: 18, kind: input, shape index: {}]   ;;  %s6697_s19 = inlined_call_operand.vmem [shape: f32[2,1,64], index: 19, kind: input, shape index: {}]   ;;  %s6698_s20 = inlined_call_operand.vmem [shape: f32[2,1,64], index: 20, kind: input, shape index: {}]   ;;  %s6699_s21 = inlined_call_operand.hbm [shape: f32[2,3], index: 21, kind: output, shape index: {}]  }
   0x1   :  { %6707 = sst [smem:[#allocation10_spill]] %s6678_s0 }
   0x2   :  { %6708 = sst [smem:[#allocation11_spill]] %s6679_s1 }
   0x3   :  { %6709 = sst [smem:[#allocation12_spill]] %s6680_s2 }
   0x4   :  { %6710 = sst [smem:[#allocation13_spill]] %s6681_s3 }
   0x5   :  { %6711 = sst [smem:[#allocation14_spill]] %s6682_s4 }
   0x6   :  { %6712 = sst [smem:[#allocation15_spill]] %s6683_s5 }
   0x7   :  { %6713 = sst [smem:[#allocation16_spill]] %s6684_s6 }
   0x8   :  { %6714 = sst [smem:[#allocation17_spill]] %s6685_s7 }
   0x9   :  { %6715 = sst [smem:[#allocation18_spill]] %s6686_s8 }
   0xa   :  { %6716 = sst [smem:[#allocation19_spill]] %s6689_s11 }
   0xb   :  { %6717 = sst [smem:[#allocation20_spill]] %s6693_s15 }
   0xc   :  { %6718 = sst [smem:[#allocation21_spill]] %s6699_s21 }
   0xd   :  { %26 = vsyncpa [#allocation4], 0  ;;  %s5947_s2 = smov 0  }
   0xe LB: > { %6719 = sst [smem:[#allocation6_spill]] %s5822_s2  ;;  %s5953_s25 = sadd.s32 4294967295, %s5822_s2   ;;  %s5822_s2 = sphi %s5947_s2, %s32_s2  }
   0xf   : > { %p4862_p0 = scmp.ge.s32.totalorder %s5822_s2, 1  ;;  %p714_p1 = scmp.lt.s32.totalorder %s5822_s2, 3 }
  0x11   : > { %p715_p2 = pnand %p4862_p0, %p714_p1 }
  0x13   : > { %718 = sbr.rel (%p715_p2) target bundleno = 4683 (0x124b), region = 104 }
  0x1a   : > { %p825_p3 = scmp.lt.s32.totalorder %s5953_s25, 1  ;;  %s6721_s30 = sld [smem:[#allocation15_spill]] }
  0x1b   : > { %s6723_s6 = sld [smem:[#allocation16_spill]]  ;;  %s6725_s7 = sld [smem:[#allocation17_spill]] }
  0x1c   : > { %s5959_s26 = scalar_select %p825_p3, %s5953_s25, 1 }
  0x1d   : > { %s6727_s11 = sld [smem:[#allocation19_spill]]  ;;  %s6728_s15 = sld [smem:[#allocation20_spill]] }
  0x1e   : > { %s5132_s27 = sshll.u32 %s5959_s26, 5  ;;  %s5136_s29 = sshll.u32 %s5959_s26, 9 }
  0x1f   : > { %s4873_s8 = sshll.u32 %s5959_s26, 4  ;;  %s5137_s23 = sshll.u32 %s5959_s26, 10 }
  0x20   : > { %s5969_s5 = scalar_lea.vmem %s6721_s30, %s5132_s27  ;;  %s6022_s24 = scalar_lea.vmem %s6695_s17, %s5137_s23 }
  0x21   : > { %6722 = sst [smem:[#allocation7_spill]] %s5969_s5  ;;  %s5974_s1 = scalar_lea.vmem %s6723_s6, %s5132_s27 }
  0x22   : > { %6724 = sst [smem:[#allocation8_spill]] %s5974_s1  ;;  %s5979_s21 = scalar_lea.vmem %s6725_s7, %s5132_s27 }
  0x23   : > { %6726 = sst [smem:[#allocation9_spill]] %s5979_s21  ;;  %s5992_s22 = scalar_lea.vmem %s6727_s11, %s5132_s27 }
  0x24   : > { %s6010_s30 = scalar_lea.vmem %s6728_s15, %s5136_s29  ;;  %s6016_s6 = scalar_lea.vmem %s6694_s16, %s4873_s8 }
  0x25   : > { %s879_s28 = scalar_lea.vmem %s6696_s18, %s5959_s26  ;;  %s882_s29 = scalar_lea.vmem %s6697_s19, %s5959_s26 }
  0x26   : > { %s885_s27 = scalar_lea.vmem %s6698_s20, %s5959_s26  ;;  %p4876_p4 = scmp.ne.s32.totalorder %s5953_s25, 0 }
  0x27   : > { %s6729_s2 = sld [smem:[#allocation11_spill]] (!%p4876_p4)  ;;  %s6730_s15 = sld [smem:[#allocation10_spill]] (!%p4876_p4)  ;;  %vm901_vm0 = vcmask (!%p4876_p4), 64512   ;;  %vm983_vm1 = vcmask (!%p4876_p4), 523264  }
  0x28   : > { %890 = sbr.rel (%p4876_p4) target bundleno = 264 (0x108), region = 108  ;;  %s6731_s0 = sld [smem:[#allocation12_spill]] (!%p4876_p4) }
  0x2d   : > { %v893_v0 = vld [vmem:[%s6729_s2] sm:$0xff] (!%p4876_p4)  ;;  %v892_v2 = vld [vmem:[%s6730_s15 + $0x8] sm:$0xff] (!%p4876_p4) }
  0x2e   : > { %v891_v1 = vld [vmem:[%s6730_s15] sm:$0xff] (!%p4876_p4)  ;;  %5378 = vmatprep.subr.mxu0 (!%p4876_p4), %v893_v0 }
  0x2f   : > { %5380 = vmatprep.mubr.msk.f32.mxu0 %vm901_vm0, %v891_v1  ;;  %5379 = vmatpush3.msra.mxu0 %v893_v0  ;;  %v4877_v3 = vld [vmem:[%s6731_s0] ss:$0 sm:$0xff] }
  0x30   : > { %5381 = vmatmul.mubr.msk.f32.vlgmr.msra.gmra.mrb[0].mxu0 %vm901_vm0, %v892_v2 }
 0x103   : > { %v5382_v4 = vpop.f32.mrb[0].mxu0 }
 0x104   : > { %v980_v5 = vadd.f32 %v5382_v4, %v4877_v3  ;;  %v974_v6 = vpop.f32.mrb[1].mxu0 }
 0x105   : > { %v975_v7 = vadd.f32 %v4877_v3, %v974_v6 }
 0x106   : > { %985 = vst.msk [vmem:[#allocation2 + $0x8] sm:$0xff] %vm983_vm1, %v980_v5 }
 0x107   : > { %984 = vst.msk [vmem:[#allocation2] sm:$0xff] %vm983_vm1, %v975_v7 }
 0x108 PF: > { %s6732_s4 = sld [smem:[#allocation8_spill]]  ;;  %s6733_s8 = sld [smem:[#allocation7_spill]]  ;;  %v5824_v9 = vmov 0.0   ;;  %vm5825_vm2 = vmmov 0   ;;  %vm1028_vm3 = vcmask 523264   ;;  %vm1239_vm4 = vcmask 130048  }
 0x109   : > { %5395 = vmatprep.subr.bf16.mxu1 %v5824_v9  ;;  %5383 = vmatprep.subr.bf16.mxu0 %v5824_v9  ;;  %s6734_s23 = scalar_lea.vmem %s6687_s9, %s5959_s26  ;;  %s6735_s3 = sld [smem:[#allocation18_spill]]  ;;  %vm1334_vm5 = vcmask 64512   ;;  %vm1362_vm6 = vcmask 1043456   ;;  %vm2150_vm7 = vcmask 261120   ;;  %vm2153_vm8 = vcmask 392192  }
 0x10a   : > { %5403 = vmatprep.mubr.msk.bf16.mxu1 %vm5825_vm2, %v5824_v9  ;;  %5391 = vmatprep.mubr.msk.bf16.mxu0 %vm5825_vm2, %v5824_v9  ;;  %v4886_v20 = vld [vmem:[%s6734_s23] ss:$0 sm:$0xff]  ;;  %s6737_s21 = sld [smem:[#allocation9_spill]]  ;;  %s5826_s0 = smov 112  }
 0x10b   : > { %s6738_s5 = scalar_lea.vmem %s6688_s10, %s5959_s26  ;;  %s5827_s2 = smov 96  }
 0x10c   : > { %v4892_v0 = vld [vmem:[%s6738_s5] ss:$0 sm:$0xff]  ;;  %s5828_s23 = smov 80   ;;  %s5829_s7 = smov 16  }
 0x10d   : > { %v987_v17 = vld [vmem:[#allocation2 + $0x8] sm:$0xff]  ;;  %s5830_s1 = smov 32   ;;  %p5125_p5 = scmp.ne.s32.totalorder %s5953_s25, 1 }
 0x10e   : > { %v5600_v8 = vld [vmem:[%s6732_s4] sm:$0xff]   ;;  %v5601_v10 = vld [vmem:[%s6732_s4 + $0x8] sm:$0xff]   ;;  %v5603_v13 = vld [vmem:[%s6732_s4 + $0x10] sm:$0xff]   ;;  %vm5834_vm9 = vmmov (!%p5125_p5), 0   ;;  %vm4568_vm10 = vcmask (!%p5125_p5), 1040384   ;;  %vm4658_vm11 = vcmask (!%p5125_p5), 17408  }
 0x10f   : > { %5396 = vmatpush3.bf16.msra.mxu1 %v5600_v8  ;;  %v5602_v11 = vld [vmem:[%s6733_s8] sm:$0xff]   ;;  %v5604_v12 = vld [vmem:[%s6733_s8 + $0x8] sm:$0xff]   ;;  %v5606_v14 = vld [vmem:[%s6733_s8 + $0x10] sm:$0xff]   ;;  %s6736_s11 = scalar_lea.vmem %s6735_s3, %s5959_s26  ;;  %s5831_s3 = smov 48  }
 0x110   : > { %5397 = vmatprep.subr.bf16.mxu1 %v5824_v9  ;;  %5384 = vmatpush3.bf16.msra.mxu0 %v5602_v11  ;;  %v5605_v15 = vld [vmem:[%s6732_s4 + $0x18] sm:$0xff]   ;;  %v986_v16 = vld [vmem:[#allocation2] sm:$0xff]  ;;  %v5609_v41 = vld [vmem:[%s6737_s21 + $0x8] sm:$0xff]  }
 0x111   : > { %5385 = vmatprep.subr.bf16.mxu0 %v5824_v9  ;;  %v5607_v18 = vld [vmem:[%s6733_s8 + $0x18] sm:$0xff]   ;;  %v988_v19 = vpack.c.bf16 %v987_v17, %v986_v16  ;;  %v4880_v25 = vld [vmem:[%s6736_s11] ss:$0 sm:$0xff]  ;;  %v5610_v42 = vld [vmem:[%s6737_s21 + $0x10] sm:$0xff]   ;;  %s6740_s8 = scalar_lea.vmem %s6691_s13, %s5959_s26 }
 0x112   : > { %v5608_v40 = vld [vmem:[%s6737_s21] sm:$0xff]   ;;  %v5611_v43 = vld [vmem:[%s6737_s21 + $0x18] sm:$0xff]   ;;  %s6739_s21 = scalar_lea.vmem %s6690_s12, %s5959_s26 }
 0x113   : > { %5398 = vmatpush3.bf16.msra.mxu1 %v5601_v10 }
 0x114   : > { %5399 = vmatprep.subr.bf16.mxu1 %v5824_v9  ;;  %5386 = vmatpush3.bf16.msra.mxu0 %v5604_v12 }
 0x115   : > { %5387 = vmatprep.subr.bf16.mxu0 %v5824_v9 }
 0x117   : > { %5400 = vmatpush3.bf16.msra.mxu1 %v5603_v13 }
 0x118   : > { %5401 = vmatprep.subr.bf16.mxu1 %v5824_v9  ;;  %5388 = vmatpush3.bf16.msra.mxu0 %v5606_v14 }
 0x119   : > { %5389 = vmatprep.subr.bf16.mxu0 %v5824_v9 }
 0x11b   : > { %5402 = vmatpush3.bf16.msra.mxu1 %v5605_v15 }
 0x11c   : > { %5419 = vmatprep.subr.bf16.mxu1 %v5824_v9  ;;  %5390 = vmatpush3.bf16.msra.mxu0 %v5607_v18 }
 0x11d   : > { %5407 = vmatprep.subr.bf16.mxu0 %v5824_v9 }
 0x11e   : > { %5404 = vmatmul.mubr.msk.bf16.vlgmr.msra.gmra.mrb[0].mxu1 %vm1028_vm3, %v988_v19 }
 0x11f   : > { %5421 = vmatprep.mubr.msk.bf16.mxu1 %vm5825_vm2, %v5824_v9  ;;  %5392 = vmatmul.mubr.msk.bf16.vlgmr.msra.gmra.mrb[0].mxu0 %vm1028_vm3, %v988_v19 }
 0x120   : > { %5415 = vmatprep.mubr.msk.bf16.mxu0 %vm5825_vm2, %v5824_v9  ;;  %5408 = vmatpush3.bf16.msra.mxu0 %v5608_v40 }
 0x121   : > { %5409 = vmatprep.subr.bf16.mxu0 %v5824_v9 }
 0x124   : > { %5410 = vmatpush3.bf16.msra.mxu0 %v5609_v41 }
 0x125   : > { %5411 = vmatprep.subr.bf16.mxu0 %v5824_v9 }
 0x128   : > { %5412 = vmatpush3.bf16.msra.mxu0 %v5610_v42 }
 0x129   : > { %5413 = vmatprep.subr.bf16.mxu0 %v5824_v9 }
 0x12c   : > { %5414 = vmatpush3.bf16.msra.mxu0 %v5611_v43 }
 0x12d   : > { %5443 = vmatprep.subr.bf16.mxu0 %v5824_v9 }
 0x12f   : > { %5416 = vmatmul.mubr.msk.bf16.vlgmr.msra.gmra.mrb[4].mxu0 %vm1028_vm3, %v988_v19 }
 0x130   : > { %5445 = vmatprep.mubr.msk.bf16.mxu0 %vm5825_vm2, %v5824_v9 }
 0x1f1   : > { %v1146_v21 = vpop.f32.mrb[0].mxu1 }
 0x1f2   : > { %v1147_v22 = vadd.f32 %v4886_v20, %v1146_v21  ;;  %v5405_v23 = vpop.f32.mrb[1].mxu1  ;;  %v1066_v26 = vpop.f32.mrb[0].mxu0 }
 0x1f3   : > { %v1149_v24 = vpop.f32.mrb[2].mxu1  ;;  %v5393_v29 = vpop.f32.mrb[1].mxu0  ;;  %v1067_v32 = vadd.f32 %v4880_v25, %v1066_v26 }
 0x1f4   : > { %v6087_v27 = vpack.c.bf16 %v1147_v22, %v1147_v22  ;;  %v5406_v28 = vpop.f32.mrb[3].mxu1  ;;  %v1069_v30 = vpop.f32.mrb[2].mxu0  ;;  %v1150_v31 = vadd.f32 %v4886_v20, %v1149_v24 }
 0x1f5   : > { %v5394_v34 = vpop.f32.mrb[3].mxu0  ;;  %v6094_v36 = vpack.c.bf16 %v1067_v32, %v1067_v32  ;;  %v1070_v38 = vadd.f32 %v4880_v25, %v1069_v30 }
 0x1f6   : > { %v1244_v33 = vsel %vm1239_vm4, %v6087_v27, 0  ;;  %v6092_v35 = vpack.c.bf16 %v1150_v31, %v1150_v31 }
 0x1f7   : > { %5420 = vmatpush3.bf16.xpose.msra.mxu1 %v1244_v33  ;;  %v6103_v39 = vpack.c.bf16 %v1070_v38, %v1070_v38 }
 0x1f8   : > { %5425 = vmatprep.subr.bf16.mxu1 %v5824_v9  ;;  %v1290_v37 = vsel %vm1239_vm4, %v6092_v35, 0 }
 0x1fe   : > { %5422 = vmatmul.mubr.msk.bf16.vlgmr.msra.gmra.mrb[4].mxu1 %vm1239_vm4, %v6094_v36 }
 0x1ff   : > { %5426 = vmatpush3.bf16.xpose.msra.mxu1 %v1290_v37  ;;  %5427 = vmatprep.mubr.msk.bf16.mxu1 %vm5825_vm2, %v5824_v9 }
 0x200   : > { %5431 = vmatprep.subr.bf16.mxu1 %v5824_v9 }
 0x202   : > { %v1226_v1 = vpop.f32.mrb[4].mxu0 }
 0x203   : > { %v1227_v2 = vadd.f32 %v4892_v0, %v1226_v1  ;;  %v5417_v3 = vpop.f32.mrb[5].mxu0 }
 0x204   : > { %v1229_v6 = vpop.f32.mrb[6].mxu0 }
 0x205   : > { %v6134_v4 = vpack.c.bf16 %v1227_v2, %v1227_v2  ;;  %v1230_v7 = vadd.f32 %v4892_v0, %v1229_v6  ;;  %v5418_v8 = vpop.f32.mrb[7].mxu0 }
 0x206   : > { %5428 = vmatmul.mubr.msk.bf16.vlgmr.msra.gmra.mrb[8].mxu1 %vm1239_vm4, %v6103_v39 }
 0x207   : > { %5433 = vmatprep.mubr.msk.bf16.mxu1 %vm5825_vm2, %v5824_v9  ;;  %v1364_v5 = vsel %vm1362_vm6, %v6134_v4, 0  ;;  %v6144_v15 = vpack.c.bf16 %v1230_v7, %v1230_v7 }
 0x208   : > { %5432 = vmatpush3.bf16.msra.mxu1 %v1364_v5 }
 0x209   : > { %5437 = vmatprep.subr.bf16.mxu1 %v5824_v9  ;;  %v1410_v19 = vsel %vm1362_vm6, %v6144_v15, 0 }
 0x2d1   : > { %v1280_v44 = vpop.f32.mrb[4].mxu1 }
 0x2d2   : > { %v1332_v45 = vmul.f32 0.25, %v1280_v44  ;;  %v5423_v46 = vpop.f32.mrb[5].mxu1 }
 0x2d3   : > { %v1283_v47 = vpop.f32.mrb[6].mxu1 }
 0x2d4   : > { %v5424_v48 = vpop.f32.mrb[7].mxu1  ;;  %v1335_v49 = vsel %vm1334_vm5, %v1332_v45, -inf }
 0x2d5   : > { %1336 = vmax.xlane.f32.xlu0 %v1335_v49 }
 0x2d9   : > { %v1326_v50 = vpop.f32.mrb[8].mxu1 }
 0x2da   : > { %v1333_v51 = vmul.f32 0.25, %v1326_v50  ;;  %v5429_v52 = vpop.f32.mrb[9].mxu1 }
 0x2db   : > { %v1329_v53 = vpop.f32.mrb[10].mxu1 }
 0x2dc   : > { %v5430_v54 = vpop.f32.mrb[11].mxu1  ;;  %v1338_v55 = vsel %vm1334_vm5, %v1333_v51, -inf }
 0x2dd   : > { %1339 = vmax.xlane.f32.xlu0 %v1338_v55 }
 0x2f3   : > { %1456 = vrot.lane.b32.xlu0 %v6087_v27, %s5826_s0 }
 0x362   : > { %v1337_v56 = vpop.xlane.xlu0 %1336 }
 0x363   : > { %v1341_v57 = vsub.f32 %v1332_v45, %v1337_v56 }
 0x365   : > { %v1343_v58 = vmul.f32 1.442695, %v1341_v57 }
 0x367   : > { %5744 = vpow2.f32 %v1343_v58 }
 0x36a   : > { %v1340_v59 = vpop.xlane.xlu0 %1339 }
 0x36b   : > { %v1342_v10 = vsub.f32 %v1333_v51, %v1340_v59 }
 0x36d   : > { %v1345_v11 = vmul.f32 1.442695, %v1342_v10 }
 0x36e   : > { %v1457_v60 = vpop.permute.xlu0 %1456 }
 0x36f   : > { %v1462_v61 = vsel %vm1239_vm4, %v1457_v60, 0  ;;  %5746 = vpow2.f32 %v1345_v11 }
 0x370   : > { %5444 = vmatpush3.bf16.xpose.msra.mxu0 %v1462_v61 }
 0x371   : > { %v5745_v62 = vpop.eup %5744  ;;  %5455 = vmatprep.subr.bf16.mxu0 %v5824_v9 }
 0x372   : > { %v1347_v63 = vsel %vm1334_vm5, %v5745_v62, 0.0 }
 0x373   : > { %1348 = vadd.xlane.f32.xlu1 %v1347_v63 }
 0x379   : > { %v5747_v12 = vpop.eup %5746 }
 0x37a   : > { %v1350_v13 = vsel %vm1334_vm5, %v5747_v12, 0.0 }
 0x384   : > { %1508 = vrot.lane.b32.xlu1 %v6092_v35, %s5826_s0 }
 0x3a8   : > { %1351 = vadd.xlane.f32.xlu1 %v1350_v13 }
 0x3b9   : > { %1453 = vrot.lane.b32.xlu1 %v6094_v36, %s5826_s0 }
 0x3bd   : > { %1505 = vrot.lane.b32.xlu1 %v6103_v39, %s5826_s0 }
 0x400   : > { %v1349_v14 = vpop.xlane.xlu1 %1348 }
 0x401   : > { %5748 = vrcp.f32 %v1349_v14 }
 0x404   : > { %v1509_v20 = vpop.permute.xlu1 %1508 }
 0x405   : > { %v1514_v26 = vsel %vm1239_vm4, %v1509_v20, 0 }
 0x40b   : > { %v5749_v16 = vpop.eup %5748 }
 0x40c   : > { %v1354_v17 = vmul.f32 %v5749_v16, %v5745_v62 }
 0x40e   : > { %v1357_v18 = vpack.c.bf16 %v1354_v17, %v1354_v17 }
 0x410   : > { %5434 = vmatmul.mubr.msk.bf16.vlgmr.msra.gmra.mrb[12].mxu1 %vm1334_vm5, %v1357_v18 }
 0x411   : > { %5438 = vmatpush3.bf16.msra.mxu1 %v1410_v19  ;;  %5439 = vmatprep.mubr.msk.bf16.mxu1 %vm5825_vm2, %v5824_v9 }
 0x412   : > { %5449 = vmatprep.subr.bf16.mxu1 %v5824_v9 }
 0x435   : > { %v1352_v21 = vpop.xlane.xlu1 %1351 }
 0x436   : > { %5750 = vrcp.f32 %v1352_v21 }
 0x439   : > { %v1454_v22 = vpop.permute.xlu1 %1453 }
 0x43a   : > { %5446 = vmatmul.mubr.msk.bf16.vlgmr.msra.gmra.mrb[8].mxu0 %vm1239_vm4, %v1454_v22 }
 0x43b   : > { %5457 = vmatprep.mubr.msk.bf16.mxu0 %vm5825_vm2, %v5824_v9 }
 0x43d   : > { %v1506_v28 = vpop.permute.xlu1 %1505 }
 0x440   : > { %v5751_v23 = vpop.eup %5750 }
 0x441   : > { %v1356_v24 = vmul.f32 %v5751_v23, %v5747_v12 }
 0x443   : > { %v1358_v25 = vpack.c.bf16 %v1356_v24, %v1356_v24 }
 0x445   : > { %5440 = vmatmul.mubr.msk.bf16.vlgmr.msra.gmra.mrb[16].mxu1 %vm1334_vm5, %v1358_v25 }
 0x446   : > { %5450 = vmatpush3.bf16.xpose.msra.mxu1 %v1514_v26  ;;  %5451 = vmatprep.mubr.msk.bf16.mxu1 %vm5825_vm2, %v5824_v9 }
 0x447   : > { %5461 = vmatprep.subr.bf16.mxu1 %v5824_v9 }
 0x44d   : > { %5452 = vmatmul.mubr.msk.bf16.vlgmr.msra.gmra.mrb[20].mxu1 %vm1239_vm4, %v1506_v28 }
 0x44e   : > { %5463 = vmatprep.mubr.msk.bf16.mxu1 %vm5825_vm2, %v5824_v9 }
 0x4e3   : > { %v6163_v29 = vpop.f32.mrb[12].mxu1 }
 0x4e4   : > { %v5435_v30 = vpop.f32.mrb[13].mxu1 }
 0x4e5   : > { %v1403_v31 = vpop.f32.mrb[14].mxu1 }
 0x4e6   : > { %v5436_v32 = vpop.f32.mrb[15].mxu1 }
 0x50d   : > { %v1498_v33 = vpop.f32.mrb[8].mxu0 }
 0x50e   : > { %v1556_v34 = vmul.f32 0.25, %v1498_v33  ;;  %v5447_v37 = vpop.f32.mrb[9].mxu0 }
 0x50f   : > { %v1501_v38 = vpop.f32.mrb[10].mxu0 }
 0x510   : > { %v5448_v40 = vpop.f32.mrb[11].mxu0  ;;  %v1558_v41 = vsel %vm1334_vm5, %v1556_v34, -inf }
 0x511   : > { %1559 = vmax.xlane.f32.xlu0 %v1558_v41 }
 0x518   : > { %v6166_v42 = vpop.f32.mrb[16].mxu1 }
 0x519   : > { %v5441_v43 = vpop.f32.mrb[17].mxu1 }
 0x51a   : > { %v1449_v44 = vpop.f32.mrb[18].mxu1 }
 0x51b   : > { %v5442_v45 = vpop.f32.mrb[19].mxu1 }
 0x520   : > { %v1550_v46 = vpop.f32.mrb[20].mxu1 }
 0x521   : > { %v1557_v47 = vmul.f32 0.25, %v1550_v46  ;;  %v5453_v48 = vpop.f32.mrb[21].mxu1 }
 0x522   : > { %v1553_v49 = vpop.f32.mrb[22].mxu1 }
 0x523   : > { %v5454_v50 = vpop.f32.mrb[23].mxu1  ;;  %v1561_v51 = vsel %vm1334_vm5, %v1557_v47, -inf }
 0x524   : > { %1562 = vmax.xlane.f32.xlu1 %v1561_v51 }
 0x535   : > { %1632 = vrot.lane.b32.xlu1 %v6144_v15, %s5826_s0 }
 0x539   : > { %1682 = vrot.lane.b32.xlu1 %v6087_v27, %s5827_s2 }
 0x53d   : > { %1732 = vrot.lane.b32.xlu1 %v6092_v35, %s5827_s2 }
 0x541   : > { %1730 = vrot.lane.b32.xlu1 %v6103_v39, %s5827_s2 }
 0x59e   : > { %v1560_v52 = vpop.xlane.xlu0 %1559 }
 0x59f   : > { %v1564_v53 = vsub.f32 %v1556_v34, %v1560_v52 }
 0x5a1   : > { %v1566_v54 = vmul.f32 1.442695, %v1564_v53 }
 0x5a3   : > { %5752 = vpow2.f32 %v1566_v54 }
 0x5ad   : > { %v5753_v55 = vpop.eup %5752 }
 0x5ae   : > { %v1570_v56 = vsel %vm1334_vm5, %v5753_v55, 0.0 }
 0x5af   : > { %1571 = vadd.xlane.f32.xlu0 %v1570_v56 }
 0x5b1   : > { %v1563_v57 = vpop.xlane.xlu1 %1562 }
 0x5b2   : > { %v1565_v58 = vsub.f32 %v1557_v47, %v1563_v57 }
 0x5b4   : > { %v1568_v59 = vmul.f32 1.442695, %v1565_v58 }
 0x5b5   : > { %v1633_v60 = vpop.permute.xlu1 %1632 }
 0x5b6   : > { %5754 = vpow2.f32 %v1568_v59  ;;  %v1638_v61 = vsel %vm1362_vm6, %v1633_v60, 0 }
 0x5b7   : > { %5462 = vmatpush3.bf16.msra.mxu1 %v1638_v61 }
 0x5b8   : > { %5473 = vmatprep.subr.bf16.mxu1 %v5824_v9 }
 0x5b9   : > { %v1683_v7 = vpop.permute.xlu1 %1682 }
 0x5ba   : > { %v1688_v13 = vsel %vm1239_vm4, %v1683_v7, 0 }
 0x5bd   : > { %v1733_v12 = vpop.permute.xlu1 %1732 }
 0x5be   : > { %v1738_v16 = vsel %vm1239_vm4, %v1733_v12, 0 }
 0x5c0   : > { %v5755_v62 = vpop.eup %5754 }
 0x5c1   : > { %v1573_v63 = vsel %vm1334_vm5, %v5755_v62, 0.0  ;;  %v1731_v18 = vpop.permute.xlu1 %1730 }
 0x5c2   : > { %1574 = vadd.xlane.f32.xlu0 %v1573_v63 }
 0x5d8   : > { %1583 = vrot.lane.b32.xlu0 %v6134_v4, %s5826_s0 }
 0x5dc   : > { %1680 = vrot.lane.b32.xlu0 %v6094_v36, %s5827_s2 }
 0x63c   : > { %v1572_v0 = vpop.xlane.xlu0 %1571 }
 0x63d   : > { %5756 = vrcp.f32 %v1572_v0 }
 0x647   : > { %v5757_v1 = vpop.eup %5756 }
 0x648   : > { %v1577_v3 = vmul.f32 %v5757_v1, %v5753_v55 }
 0x64a   : > { %v1580_v8 = vpack.c.bf16 %v1577_v3, %v1577_v3 }
 0x64f   : > { %v1575_v2 = vpop.xlane.xlu0 %1574 }
 0x650   : > { %5758 = vrcp.f32 %v1575_v2 }
 0x653   : > { %v1584_v5 = vpop.permute.xlu0 %1583 }
 0x654   : > { %v1589_v6 = vsel %vm1362_vm6, %v1584_v5, 0 }
 0x655   : > { %5456 = vmatpush3.bf16.msra.mxu0 %v1589_v6 }
 0x656   : > { %5467 = vmatprep.subr.bf16.mxu0 %v5824_v9 }
 0x657   : > { %v1681_v17 = vpop.permute.xlu0 %1680 }
 0x658   : > { %5458 = vmatmul.mubr.msk.bf16.vlgmr.msra.gmra.mrb[12].mxu0 %vm1334_vm5, %v1580_v8 }
 0x659   : > { %5469 = vmatprep.mubr.msk.bf16.mxu0 %vm5825_vm2, %v5824_v9 }
 0x65a   : > { %v5759_v10 = vpop.eup %5758 }
 0x65b   : > { %v1579_v11 = vmul.f32 %v5759_v10, %v5755_v62 }
 0x65d   : > { %v1581_v14 = vpack.c.bf16 %v1579_v11, %v1579_v11 }
 0x65e   : > { %5468 = vmatpush3.bf16.xpose.msra.mxu0 %v1688_v13 }
 0x65f   : > { %5464 = vmatmul.mubr.msk.bf16.vlgmr.msra.gmra.mrb[24].mxu1 %vm1334_vm5, %v1581_v14  ;;  %5479 = vmatprep.subr.bf16.mxu0 %v5824_v9 }
 0x660   : > { %5474 = vmatpush3.bf16.xpose.msra.mxu1 %v1738_v16  ;;  %5475 = vmatprep.mubr.msk.bf16.mxu1 %vm5825_vm2, %v5824_v9 }
 0x661   : > { %5485 = vmatprep.subr.bf16.mxu1 %v5824_v9 }
 0x665   : > { %5470 = vmatmul.mubr.msk.bf16.vlgmr.msra.gmra.mrb[16].mxu0 %vm1239_vm4, %v1681_v17 }
 0x666   : > { %5481 = vmatprep.mubr.msk.bf16.mxu0 %vm5825_vm2, %v5824_v9 }
 0x667   : > { %5476 = vmatmul.mubr.msk.bf16.vlgmr.msra.gmra.mrb[28].mxu1 %vm1239_vm4, %v1731_v18 }
 0x668   : > { %5487 = vmatprep.mubr.msk.bf16.mxu1 %vm5825_vm2, %v5824_v9 }
 0x72b   : > { %v6203_v19 = vpop.f32.mrb[12].mxu0 }
 0x72c   : > { %v5459_v20 = vpop.f32.mrb[13].mxu0 }
 0x72d   : > { %v1628_v21 = vpop.f32.mrb[14].mxu0 }
 0x72e   : > { %v5460_v22 = vpop.f32.mrb[15].mxu0 }
 0x732   : > { %v6205_v23 = vpop.f32.mrb[24].mxu1 }
 0x733   : > { %v5585_v24 = vpack.i.bf16 %v6205_v23, %v6203_v19  ;;  %v5465_v25 = vpop.f32.mrb[25].mxu1 }
 0x734   : > { %v1677_v26 = vpop.f32.mrb[26].mxu1 }
 0x735   : > { %v5466_v28 = vpop.f32.mrb[27].mxu1 }
 0x738   : > { %v1724_v30 = vpop.f32.mrb[16].mxu0 }
 0x739   : > { %v1780_v31 = vmul.f32 0.25, %v1724_v30  ;;  %v5471_v32 = vpop.f32.mrb[17].mxu0 }
 0x73a   : > { %v1727_v33 = vpop.f32.mrb[18].mxu0  ;;  %v1774_v34 = vpop.f32.mrb[28].mxu1 }
 0x73b   : > { %v1781_v37 = vmul.f32 0.25, %v1774_v34  ;;  %v5472_v38 = vpop.f32.mrb[19].mxu0  ;;  %v5477_v40 = vpop.f32.mrb[29].mxu1  ;;  %v1782_v41 = vsel %vm1334_vm5, %v1780_v31, -inf }
 0x73c   : > { %v1777_v43 = vpop.f32.mrb[30].mxu1  ;;  %1783 = vmax.xlane.f32.xlu0 %v1782_v41 }
 0x73d   : > { %v5478_v44 = vpop.f32.mrb[31].mxu1  ;;  %v1785_v45 = vsel %vm1334_vm5, %v1781_v37, -inf }
 0x73e   : > { %1786 = vmax.xlane.f32.xlu1 %v1785_v45 }
 0x74f   : > { %1854 = vrot.lane.b32.xlu1 %v6144_v15, %s5827_s2 }
 0x753   : > { %1904 = vrot.lane.b32.xlu1 %v6087_v27, %s5828_s23 }
 0x757   : > { %1954 = vrot.lane.b32.xlu1 %v6092_v35, %s5828_s23 }
 0x75b   : > { %1952 = vrot.lane.b32.xlu1 %v6103_v39, %s5828_s23 }
 0x7c9   : > { %v1784_v46 = vpop.xlane.xlu0 %1783 }
 0x7ca   : > { %v1788_v47 = vsub.f32 %v1780_v31, %v1784_v46 }
 0x7cb   : > { %v1787_v48 = vpop.xlane.xlu1 %1786 }
 0x7cc   : > { %v1790_v49 = vmul.f32 1.442695, %v1788_v47  ;;  %v1789_v50 = vsub.f32 %v1781_v37, %v1787_v48 }
 0x7ce   : > { %5760 = vpow2.f32 %v1790_v49  ;;  %v1792_v51 = vmul.f32 1.442695, %v1789_v50 }
 0x7cf   : > { %v1855_v52 = vpop.permute.xlu1 %1854 }
 0x7d0   : > { %5762 = vpow2.f32 %v1792_v51  ;;  %v1860_v53 = vsel %vm1362_vm6, %v1855_v52, 0 }
 0x7d1   : > { %5486 = vmatpush3.bf16.msra.mxu1 %v1860_v53 }
 0x7d2   : > { %5497 = vmatprep.subr.bf16.mxu1 %v5824_v9 }
 0x7d3   : > { %v1905_v60 = vpop.permute.xlu1 %1904 }
 0x7d7   : > { %v1955_v1 = vpop.permute.xlu1 %1954 }
 0x7d8   : > { %v5761_v27 = vpop.eup %5760  ;;  %v1960_v3 = vsel %vm1239_vm4, %v1955_v1, 0 }
 0x7d9   : > { %v1794_v35 = vsel %vm1334_vm5, %v5761_v27, 0.0 }
 0x7da   : > { %v5763_v54 = vpop.eup %5762  ;;  %1795 = vadd.xlane.f32.xlu0 %v1794_v35 }
 0x7db   : > { %v1797_v39 = vsel %vm1334_vm5, %v5763_v54, 0.0  ;;  %v1953_v6 = vpop.permute.xlu1 %1952 }
 0x7de   : > { %1798 = vadd.xlane.f32.xlu0 %v1797_v39  ;;  %v5613_v39 = vld [vmem:[%s5992_s22 + $0x8] sm:$0xff]  }
 0x7f4   : > { %1806 = vrot.lane.b32.xlu0 %v6134_v4, %s5827_s2 }
 0x7f8   : > { %1902 = vrot.lane.b32.xlu0 %v6094_v36, %s5828_s23  ;;  %v1910_v36 = vsel %vm1239_vm4, %v1905_v60, 0 }
 0x867   : > { %v1796_v55 = vpop.xlane.xlu0 %1795 }
 0x868   : > { %5764 = vrcp.f32 %v1796_v55  ;;  %v5614_v55 = vld [vmem:[%s5992_s22 + $0x10] sm:$0xff]  }
 0x86b   : > { %v1799_v56 = vpop.xlane.xlu0 %1798 }
 0x86c   : > { %5766 = vrcp.f32 %v1799_v56  ;;  %v5615_v56 = vld [vmem:[%s5992_s22 + $0x18] sm:$0xff]  }
 0x86f   : > { %v1807_v57 = vpop.permute.xlu0 %1806 }
 0x870   : > { %v1812_v58 = vsel %vm1362_vm6, %v1807_v57, 0 }
 0x871   : > { %5480 = vmatpush3.bf16.msra.mxu0 %v1812_v58 }
 0x872   : > { %v5765_v59 = vpop.eup %5764  ;;  %5491 = vmatprep.subr.bf16.mxu0 %v5824_v9 }
 0x873   : > { %v1801_v61 = vmul.f32 %v5765_v59, %v5761_v27  ;;  %v1903_v5 = vpop.permute.xlu0 %1902 }
 0x875   : > { %v1804_v62 = vpack.c.bf16 %v1801_v61, %v1801_v61 }
 0x876   : > { %v5767_v63 = vpop.eup %5766 }
 0x877   : > { %v1803_v0 = vmul.f32 %v5767_v63, %v5763_v54  ;;  %5482 = vmatmul.mubr.msk.bf16.vlgmr.msra.gmra.mrb[20].mxu0 %vm1334_vm5, %v1804_v62  ;;  %v5612_v54 = vld [vmem:[%s5992_s22] sm:$0xff]   ;;  %s6742_s22 = sld [smem:[#allocation13_spill]] (!%p5125_p5) }
 0x878   : > { %5493 = vmatprep.mubr.msk.bf16.mxu0 %vm5825_vm2, %v5824_v9 }
 0x879   : > { %v1805_v2 = vpack.c.bf16 %v1803_v0, %v1803_v0 }
 0x87a   : > { %5492 = vmatpush3.bf16.xpose.msra.mxu0 %v1910_v36 }
 0x87b   : > { %5488 = vmatmul.mubr.msk.bf16.vlgmr.msra.gmra.mrb[32].mxu1 %vm1334_vm5, %v1805_v2  ;;  %5503 = vmatprep.subr.bf16.mxu0 %v5824_v9 }
 0x87c   : > { %5498 = vmatpush3.bf16.xpose.msra.mxu1 %v1960_v3  ;;  %5499 = vmatprep.mubr.msk.bf16.mxu1 %vm5825_vm2, %v5824_v9 }
 0x87d   : > { %5509 = vmatprep.subr.bf16.mxu1 %v5824_v9 }
 0x881   : > { %5494 = vmatmul.mubr.msk.bf16.vlgmr.msra.gmra.mrb[24].mxu0 %vm1239_vm4, %v1903_v5 }
 0x882   : > { %5505 = vmatprep.mubr.msk.bf16.mxu0 %vm5825_vm2, %v5824_v9 }
 0x883   : > { %5500 = vmatmul.mubr.msk.bf16.vlgmr.msra.gmra.mrb[36].mxu1 %vm1239_vm4, %v1953_v6 }
 0x884   : > { %5511 = vmatprep.mubr.msk.bf16.mxu1 %vm5825_vm2, %v5824_v9 }
 0x94a   : > { %v1848_v7 = vpop.f32.mrb[20].mxu0 }
 0x94b   : > { %v5483_v8 = vpop.f32.mrb[21].mxu0 }
 0x94c   : > { %v1851_v10 = vpop.f32.mrb[22].mxu0 }
 0x94d   : > { %v5484_v11 = vpop.f32.mrb[23].mxu0 }
 0x94e   : > { %v1896_v12 = vpop.f32.mrb[32].mxu1 }
 0x94f   : > { %v5590_v13 = vpack.i.bf16 %v1896_v12, %v1848_v7  ;;  %v5489_v14 = vpop.f32.mrb[33].mxu1 }
 0x950   : > { %v1899_v16 = vpop.f32.mrb[34].mxu1 }
 0x951   : > { %v5490_v17 = vpop.f32.mrb[35].mxu1 }
 0x954   : > { %v1946_v18 = vpop.f32.mrb[24].mxu0 }
 0x955   : > { %v2002_v20 = vmul.f32 0.25, %v1946_v18  ;;  %v5495_v21 = vpop.f32.mrb[25].mxu0 }
 0x956   : > { %v1949_v22 = vpop.f32.mrb[26].mxu0  ;;  %v1996_v25 = vpop.f32.mrb[36].mxu1 }
 0x957   : > { %v2003_v26 = vmul.f32 0.25, %v1996_v25  ;;  %v5496_v28 = vpop.f32.mrb[27].mxu0  ;;  %v5501_v30 = vpop.f32.mrb[37].mxu1  ;;  %v2004_v31 = vsel %vm1334_vm5, %v2002_v20, -inf }
 0x958   : > { %v1999_v32 = vpop.f32.mrb[38].mxu1  ;;  %2005 = vmax.xlane.f32.xlu0 %v2004_v31  ;;  %v5784_v28 = vld [vmem:[#allocation2] sm:$0xff] }
 0x959   : > { %v5502_v33 = vpop.f32.mrb[39].mxu1  ;;  %v2007_v34 = vsel %vm1334_vm5, %v2003_v26, -inf  ;;  %v5785_v32 = vld [vmem:[#allocation2 + $0x8] sm:$0xff] }
 0x95a   : > { %2008 = vmax.xlane.f32.xlu1 %v2007_v34 }
 0x96b   : > { %2076 = vrot.lane.b32.xlu1 %v6144_v15, %s5828_s23 }
 0x96f   : > { %5586 = vrot.lane.b32.xlu1 %v5585_v24, %s5829_s7 }
 0x973   : > { %5591 = vrot.lane.b32.xlu1 %v5590_v13, %s5830_s1 }
 0x9e5   : > { %v2006_v37 = vpop.xlane.xlu0 %2005 }
 0x9e6   : > { %v2010_v38 = vsub.f32 %v2002_v20, %v2006_v37  ;;  %v4914_v20 = vld [vmem:[%s6739_s21] ss:$0 sm:$0xff] }
 0x9e7   : > { %v2009_v40 = vpop.xlane.xlu1 %2008 }
 0x9e8   : > { %v2012_v41 = vmul.f32 1.442695, %v2010_v38  ;;  %v2011_v43 = vsub.f32 %v2003_v26, %v2009_v40 }
 0x9ea   : > { %5768 = vpow2.f32 %v2012_v41  ;;  %v2014_v44 = vmul.f32 1.442695, %v2011_v43 }
 0x9eb   : > { %v2077_v45 = vpop.permute.xlu1 %2076 }
 0x9ec   : > { %5770 = vpow2.f32 %v2014_v44  ;;  %v2082_v46 = vsel %vm1362_vm6, %v2077_v45, 0 }
 0x9ed   : > { %5510 = vmatpush3.bf16.msra.mxu1 %v2082_v46 }
 0x9ef   : > { %v5587_v36 = vpop.permute.xlu1 %5586 }
 0x9f0   : > { %v5589_v3 = vunpack.i.h.bf16 %v5587_v36  ;;  %v5588_v5 = vunpack.i.l.bf16 %v5587_v36  ;;  %v2344_v36 = vld [vmem:[%s6010_s30 + $0x1c0] sm:$0xff] }
 0x9f2   : > { %v2149_v8 = vsel %vm1239_vm4, %v6166_v42, %v5589_v3  ;;  %v2148_v10 = vsel %vm1239_vm4, %v6163_v29, %v5588_v5  ;;  %v2345_v5 = vld [vmem:[%s6010_s30 + $0x1c8] sm:$0xff] }
 0x9f3   : > { %v5592_v2 = vpop.permute.xlu1 %5591 }
 0x9f4   : > { %v5769_v15 = vpop.eup %5768  ;;  %v5594_v6 = vunpack.i.h.bf16 %v5592_v2 }
 0x9f5   : > { %v2016_v47 = vsel %vm1334_vm5, %v5769_v15, 0.0 }
 0x9f6   : > { %v5771_v48 = vpop.eup %5770  ;;  %2017 = vadd.xlane.f32.xlu0 %v2016_v47  ;;  %v2152_v13 = vsel %vm2150_vm7, %v2149_v8, %v5594_v6  ;;  %v2290_v8 = vld [vmem:[%s6010_s30 + $0x10] sm:$0xff] }
 0x9f7   : > { %v2019_v19 = vsel %vm1334_vm5, %v5771_v48, 0.0 }
 0x9fa   : > { %2020 = vadd.xlane.f32.xlu0 %v2019_v19  ;;  %v2296_v19 = vld [vmem:[%s6010_s30 + $0x40] sm:$0xff] }
 0xa10   : > { %2028 = vrot.lane.b32.xlu0 %v6134_v4, %s5828_s23  ;;  %s6741_s23 = scalar_lea.vmem %s6692_s14, %s5959_s26 }
 0xa83   : > { %v2018_v23 = vpop.xlane.xlu0 %2017 }
 0xa84   : > { %5772 = vrcp.f32 %v2018_v23  ;;  %v2289_v23 = vld [vmem:[%s6010_s30 + $0x8] sm:$0xff] }
 0xa87   : > { %v2021_v24 = vpop.xlane.xlu0 %2020 }
 0xa88   : > { %5774 = vrcp.f32 %v2021_v24 }
 0xa8b   : > { %v2029_v49 = vpop.permute.xlu0 %2028 }
 0xa8c   : > { %v2034_v50 = vsel %vm1362_vm6, %v2029_v49, 0  ;;  %v2297_v49 = vld [vmem:[%s6010_s30 + $0x48] sm:$0xff] }
 0xa8d   : > { %5504 = vmatpush3.bf16.msra.mxu0 %v2034_v50 }
 0xa8e   : > { %v5773_v51 = vpop.eup %5772  ;;  %5515 = vmatprep.subr.bf16.mxu0 %v5824_v9 }
 0xa8f   : > { %v2023_v52 = vmul.f32 %v5773_v51, %v5769_v15  ;;  %v4924_v51 = vcombine.low %v2289_v23, %v2297_v49 }
 0xa91   : > { %v2026_v53 = vpack.c.bf16 %v2023_v52, %v2023_v52  ;;  %v4925_v52 = vcombine.high %v2289_v23, %v2297_v49  ;;  %v2323_v23 = vld [vmem:[%s6010_s30 + $0x118] sm:$0xff] }
 0xa92   : > { %v5775_v27 = vpop.eup %5774 }
 0xa93   : > { %v2025_v35 = vmul.f32 %v5775_v27, %v5771_v48  ;;  %5506 = vmatmul.mubr.msk.bf16.vlgmr.msra.gmra.mrb[28].mxu0 %vm1334_vm5, %v2026_v53  ;;  %v2288_v48 = vld [vmem:[%s6010_s30] sm:$0xff] }
 0xa94   : > { %5523 = vmatprep.mubr.msk.bf16.mxu0 %vm5825_vm2, %v5824_v9  ;;  %5516 = vmatpush3.bf16.msra.mxu0 %v5612_v54  ;;  %v4923_v24 = vcombine.high %v2288_v48, %v2296_v19  ;;  %v4922_v50 = vcombine.low %v2288_v48, %v2296_v19  ;;  %v2304_v53 = vld [vmem:[%s6010_s30 + $0x80] sm:$0xff]  ;;  %v2313_v54 = vld [vmem:[%s6010_s30 + $0xc8] sm:$0xff]  ;;  %v2322_v48 = vld [vmem:[%s6010_s30 + $0x110] sm:$0xff] }
 0xa95   : > { %v2027_v4 = vpack.c.bf16 %v2025_v35, %v2025_v35  ;;  %5517 = vmatprep.subr.bf16.mxu0 %v5824_v9  ;;  %v2312_v27 = vld [vmem:[%s6010_s30 + $0xc0] sm:$0xff]  ;;  %v2305_v35 = vld [vmem:[%s6010_s30 + $0x88] sm:$0xff]  ;;  %v2330_v19 = vld [vmem:[%s6010_s30 + $0x150] sm:$0xff] }
 0xa96   : > { %2759 = vmatprep.subr.bf16.mxu1 %v4923_v24  ;;  %v2331_v24 = vld [vmem:[%s6010_s30 + $0x158] sm:$0xff] }
 0xa97   : > { %5512 = vmatmul.mubr.msk.bf16.vlgmr.msra.gmra.mrb[40].mxu1 %vm1334_vm5, %v2027_v4  ;;  %v4939_v4 = vcombine.high %v2304_v53, %v2312_v27 }
 0xa98   : > { %5518 = vmatpush3.bf16.msra.mxu0 %v5613_v39  ;;  %2760 = vmatpush1.bf16.msra.mxu1 %v4922_v50  ;;  %v4938_v39 = vcombine.low %v2304_v53, %v2312_v27  ;;  %v2338_v53 = vld [vmem:[%s6010_s30 + $0x190] sm:$0xff] }
 0xa99   : > { %5519 = vmatprep.subr.bf16.mxu0 %v5824_v9  ;;  %2761 = vmatprep.subr.bf16.mxu1 %v4939_v4  ;;  %v2346_v27 = vld [vmem:[%s6010_s30 + $0x1d0] sm:$0xff]  ;;  %v2347_v4 = vld [vmem:[%s6010_s30 + $0x1d8] sm:$0xff] }
 0xa9c   : > { %5520 = vmatpush3.bf16.msra.mxu0 %v5614_v55  ;;  %v4940_v55 = vcombine.low %v2305_v35, %v2313_v54  ;;  %2762 = vmatpush1.bf16.msra.mxu1 %v4938_v39  ;;  %v4960_v39 = vcombine.low %v2323_v23, %v2331_v24 }
 0xa9d   : > { %5521 = vmatprep.subr.bf16.mxu0 %v5824_v9  ;;  %v5593_v9 = vunpack.i.l.bf16 %v5592_v2  ;;  %v2337_v2 = vld [vmem:[%s6010_s30 + $0x188] sm:$0xff] }
 0xa9f   : > { %v2151_v14 = vsel %vm2150_vm7, %v2148_v10, %v5593_v9  ;;  %v4972_v9 = vcombine.low %v2337_v2, %v2345_v5  ;;  %v2298_v10 = vld [vmem:[%s6010_s30 + $0x50] sm:$0xff] }
 0xaa0   : > { %5522 = vmatpush3.bf16.msra.mxu0 %v5615_v56  ;;  %v4941_v56 = vcombine.high %v2305_v35, %v2313_v54  ;;  %v2339_v35 = vld [vmem:[%s6010_s30 + $0x198] sm:$0xff]  ;;  %v4958_v54 = vcombine.low %v2322_v48, %v2330_v19 }
 0xaa1   : > { %2802 = vmatprep.subr.bf16.mxu0 %v4925_v52  ;;  %v4961_v52 = vcombine.high %v2323_v23, %v2331_v24 }
 0xb66   : > { %v2070_v57 = vpop.f32.mrb[28].mxu0 }
 0xb67   : > { %v5507_v58 = vpop.f32.mrb[29].mxu0 }
 0xb68   : > { %v2073_v59 = vpop.f32.mrb[30].mxu0  ;;  %v2328_v58 = vld [vmem:[%s6010_s30 + $0x140] sm:$0xff] }
 0xb69   : > { %v5508_v60 = vpop.f32.mrb[31].mxu0  ;;  %v2321_v59 = vld [vmem:[%s6010_s30 + $0x108] sm:$0xff] }
 0xb6a   : > { %v2118_v61 = vpop.f32.mrb[40].mxu1 }
 0xb6b   : > { %v5595_v62 = vpack.i.bf16 %v2118_v61, %v2070_v57  ;;  %v5513_v63 = vpop.f32.mrb[41].mxu1  ;;  %v2320_v57 = vld [vmem:[%s6010_s30 + $0x100] sm:$0xff]  ;;  %v2329_v61 = vld [vmem:[%s6010_s30 + $0x148] sm:$0xff] }
 0xb6c   : > { %v2121_v0 = vpop.f32.mrb[42].mxu1  ;;  %v4955_v60 = vcombine.high %v2320_v57, %v2328_v58  ;;  %v4956_v63 = vcombine.low %v2321_v59, %v2329_v61 }
 0xb6d   : > { %v5514_v1 = vpop.f32.mrb[43].mxu1  ;;  %5596 = vrot.lane.b32.xlu0 %v5595_v62, %s5831_s3  ;;  %v4954_v62 = vcombine.low %v2320_v57, %v2328_v58  ;;  %v4957_v0 = vcombine.high %v2321_v59, %v2329_v61  ;;  %v2292_v57 = vld [vmem:[%s6010_s30 + $0x20] sm:$0xff]  ;;  %v2293_v59 = vld [vmem:[%s6010_s30 + $0x28] sm:$0xff]  ;;  %v4974_v61 = vcombine.low %v2338_v53, %v2346_v27 }
 0xb6e   : > { %2763 = vmatprep.subr.bf16.mxu1 %v4955_v60  ;;  %v2336_v1 = vld [vmem:[%s6010_s30 + $0x180] sm:$0xff]  ;;  %v2301_v60 = vld [vmem:[%s6010_s30 + $0x68] sm:$0xff] }
 0xb6f   : > { %2764 = vmatpush1.bf16.msra.mxu1 %v4954_v62  ;;  %v4971_v3 = vcombine.high %v2336_v1, %v2344_v36  ;;  %v4970_v6 = vcombine.low %v2336_v1, %v2344_v36  ;;  %v2300_v58 = vld [vmem:[%s6010_s30 + $0x60] sm:$0xff]  ;;  %v4976_v62 = vcombine.low %v2339_v35, %v2347_v4 }
 0xb70   : > { %v2308_v1 = vld [vmem:[%s6010_s30 + $0xa0] sm:$0xff] }
 0xb71   : > { %2765 = vmatprep.subr.bf16.mxu1 %v4971_v3  ;;  %v2316_v36 = vld [vmem:[%s6010_s30 + $0xe0] sm:$0xff]  ;;  %v2317_v3 = vld [vmem:[%s6010_s30 + $0xe8] sm:$0xff] }
 0xb73   : > { %2766 = vmatpush1.bf16.msra.mxu1 %v4970_v6  ;;  %v4932_v6 = vcombine.low %v2293_v59, %v2301_v60 }
 0xbdf   : > { %v5597_v7 = vpop.permute.xlu0 %5596 }
 0xbe0   : > { %v5599_v11 = vunpack.i.h.bf16 %v5597_v7  ;;  %v5598_v12 = vunpack.i.l.bf16 %v5597_v7  ;;  %v4973_v7 = vcombine.high %v2337_v2, %v2345_v5  ;;  %v2309_v2 = vld [vmem:[%s6010_s30 + $0xa8] sm:$0xff]  ;;  %v4930_v5 = vcombine.low %v2292_v57, %v2300_v58 }
 0xbe2   : > { %v2155_v16 = vsel %vm2153_vm8, %v2152_v13, %v5599_v11  ;;  %v2154_v17 = vsel %vm2153_vm8, %v2151_v14, %v5598_v12  ;;  %v2291_v11 = vld [vmem:[%s6010_s30 + $0x18] sm:$0xff]  ;;  %v4926_v12 = vcombine.low %v2290_v8, %v2298_v10  ;;  %v4927_v13 = vcombine.high %v2290_v8, %v2298_v10  ;;  %v2324_v8 = vld [vmem:[%s6010_s30 + $0x120] sm:$0xff] }
 0xbe3   : > { %v2156_v18 = vpack.c.bf16 %v2155_v16, %v2154_v17  ;;  %v2299_v14 = vld [vmem:[%s6010_s30 + $0x58] sm:$0xff]  ;;  %v5832_v16 = vmov 0   ;;  %v2332_v10 = vld [vmem:[%s6010_s30 + $0x160] sm:$0xff] }
 0xbe4   : > { %2791 = vmatprep.mubr.bf16.mxu1 %v5832_v16  ;;  %v4928_v17 = vcombine.low %v2291_v11, %v2299_v14  ;;  %2845 = vmatprep.subr.bf16.mxu1 %v4927_v13  ;;  %v4946_v13 = vcombine.low %v2308_v1, %v2316_v36 }
 0xbe5   : > { %5524 = vmatmul.mubr.msk.bf16.vlgmr.msra.gmra.mrb[32].mxu0 %vm1028_vm3, %v2156_v18  ;;  %v4929_v18 = vcombine.high %v2291_v11, %v2299_v14  ;;  %v2325_v11 = vld [vmem:[%s6010_s30 + $0x128] sm:$0xff]  ;;  %v4948_v14 = vcombine.low %v2309_v2, %v2317_v3 }
 0xbe6   : > { %2803 = vmatpush1.bf16.msra.mxu0 %v4924_v51  ;;  %2834 = vmatprep.mubr.bf16.mxu0 %v5832_v16  ;;  %v4959_v51 = vcombine.high %v2322_v48, %v2330_v19 }
 0xbe7   : > { %2804 = vmatprep.subr.bf16.mxu0 %v4941_v56  ;;  %v4977_v56 = vcombine.high %v2339_v35, %v2347_v4 }
 0xbea   : > { %2805 = vmatpush1.bf16.msra.mxu0 %v4940_v55  ;;  %v4975_v55 = vcombine.high %v2338_v53, %v2346_v27 }
 0xbeb   : > { %2806 = vmatprep.subr.bf16.mxu0 %v4957_v0  ;;  %v4933_v0 = vcombine.high %v2293_v59, %v2301_v60 }
 0xbee   : > { %2807 = vmatpush1.bf16.msra.mxu0 %v4956_v63  ;;  %v4931_v63 = vcombine.high %v2292_v57, %v2300_v58 }
 0xbef   : > { %2808 = vmatprep.subr.bf16.mxu0 %v4973_v7  ;;  %v4949_v7 = vcombine.high %v2309_v2, %v2317_v3  ;;  %v5621_v2 = vld [vmem:[%s6022_s24 + $0xc8] sm:$0xff]  }
 0xbf0   : > { %v5622_v3 = vld [vmem:[%s6022_s24 + $0x8] sm:$0xff]  }
 0xbf2   : > { %2809 = vmatpush1.bf16.msra.mxu0 %v4972_v9  ;;  %v4947_v9 = vcombine.high %v2308_v1, %v2316_v36  ;;  %v5619_v1 = vld [vmem:[%s6022_s24 + $0x80] sm:$0xff]   ;;  %v5620_v36 = vld [vmem:[%s6022_s24 + $0x48] sm:$0xff]  }
 0xbf3   : > { %2888 = vmatprep.subr.bf16.mxu0 %v4929_v18 }
 0xcb8   : > { %v2233_v21 = vpop.f32.mrb[32].mxu0 }
 0xcb9   : > { %v2234_v22 = vadd.f32 %v4914_v20, %v2233_v21  ;;  %v5525_v42 = vpop.f32.mrb[33].mxu0 }
 0xcba   : > { %v2236_v25 = vpop.f32.mrb[34].mxu0 }
 0xcbb   : > { %v2237_v26 = vadd.f32 %v4914_v20, %v2236_v25  ;;  %v5526_v29 = vpop.f32.mrb[35].mxu0  ;;  %v2240_v30 = vadd.f32 %v5784_v28, %v2234_v22 }
 0xcbd   : > { %v2244_v31 = vsel %vm1028_vm3, %v2240_v30, 0.0  ;;  %v2241_v33 = vadd.f32 %v5785_v32, %v2237_v26 }
 0xcbe   : > { %2245 = vadd.xlane.f32.xlu1 %v2244_v31 }
 0xcbf   : > { %v2247_v34 = vsel %vm1028_vm3, %v2241_v33, 0.0 }
 0xcc0   : > { %2248 = vadd.xlane.f32.xlu0 %v2247_v34  ;;  %v4921_v34 = vld [vmem:[%s6741_s23] ss:$0 sm:$0xff] }
 0xd4b   : > { %v2246_v37 = vpop.xlane.xlu1 %2245 }
 0xd4c   : > { %v2251_v38 = vmul.f32 0.015625, %v2246_v37 }
 0xd4d   : > { %v2249_v40 = vpop.xlane.xlu0 %2248 }
 0xd4e   : > { %v6282_v41 = vsub.f32 %v2240_v30, %v2251_v38  ;;  %v2252_v43 = vmul.f32 0.015625, %v2249_v40  ;;  %v4920_v30 = vld [vmem:[%s6740_s8] ss:$0 sm:$0xff]  ;;  %v2306_v38 = vld [vmem:[%s6010_s30 + $0x90] sm:$0xff] }
 0xd4f   : > { %v2314_v40 = vld [vmem:[%s6010_s30 + $0xd0] sm:$0xff] }
 0xd50   : > { %v6284_v44 = vsub.f32 %v2241_v33, %v2252_v43  ;;  %v2255_v45 = vmul.f32 %v6282_v41, %v6282_v41  ;;  %v2315_v43 = vld [vmem:[%s6010_s30 + $0xd8] sm:$0xff]  ;;  %v4942_v49 = vcombine.low %v2306_v38, %v2314_v40 }
 0xd52   : > { %v2257_v46 = vsel %vm1028_vm3, %v2255_v45, 0.0  ;;  %v2256_v15 = vmul.f32 %v6284_v44, %v6284_v44 }
 0xd53   : > { %2258 = vadd.xlane.f32.xlu0 %v2257_v46 }
 0xd54   : > { %v2260_v47 = vsel %vm1028_vm3, %v2256_v15, 0.0 }
 0xd57   : > { %2261 = vadd.xlane.f32.xlu0 %v2260_v47  ;;  %v4943_v47 = vcombine.high %v2306_v38, %v2314_v40 }
 0xde0   : > { %v2259_v20 = vpop.xlane.xlu0 %2258 }
 0xde1   : > { %v2263_v21 = vmul.f32 0.015625, %v2259_v20  ;;  %v2340_v20 = vld [vmem:[%s6010_s30 + $0x1a0] sm:$0xff] }
 0xde3   : > { %v2265_v22 = vadd.f32 1e-05, %v2263_v21  ;;  %v2348_v21 = vld [vmem:[%s6010_s30 + $0x1e0] sm:$0xff] }
 0xde4   : > { %v2262_v42 = vpop.xlane.xlu0 %2261 }
 0xde5   : > { %5776 = vrsqrt.f32 %v2265_v22  ;;  %v2264_v25 = vmul.f32 0.015625, %v2262_v42  ;;  %v2341_v22 = vld [vmem:[%s6010_s30 + $0x1a8] sm:$0xff] }
 0xde6   : > { %v2349_v42 = vld [vmem:[%s6010_s30 + $0x1e8] sm:$0xff] }
 0xde7   : > { %v2266_v26 = vadd.f32 1e-05, %v2264_v25  ;;  %v4962_v25 = vcombine.low %v2324_v8, %v2332_v10 }
 0xde9   : > { %5778 = vrsqrt.f32 %v2266_v26 }
 0xdef   : > { %v5777_v29 = vpop.eup %5776 }
 0xdf0   : > { %v2269_v28 = vmul.f32 %v5777_v29, %v6282_v41  ;;  %v2307_v41 = vld [vmem:[%s6010_s30 + $0x98] sm:$0xff]  ;;  %v4979_v29 = vcombine.high %v2340_v20, %v2348_v21 }
 0xdf1   : > { %v4944_v50 = vcombine.low %v2307_v41, %v2315_v43 }
 0xdf2   : > { %v2277_v32 = vmul.f32 %v4920_v30, %v2269_v28  ;;  %v4981_v28 = vcombine.high %v2341_v22, %v2349_v42 }
 0xdf3   : > { %v5779_v31 = vpop.eup %5778 }
 0xdf4   : > { %v2270_v33 = vmul.f32 %v5779_v31, %v6284_v44  ;;  %v6330_v45 = vadd.f32 %v4921_v34, %v2277_v32  ;;  %v4945_v44 = vcombine.high %v2307_v41, %v2315_v43  ;;  %v2302_v31 = vld [vmem:[%s6010_s30 + $0x70] sm:$0xff]  ;;  %v2295_v32 = vld [vmem:[%s6010_s30 + $0x38] sm:$0xff] }
 0xdf5   : > { %v2310_v41 = vld [vmem:[%s6010_s30 + $0xb0] sm:$0xff] }
 0xdf6   : > { %v2278_v37 = vmul.f32 %v4920_v30, %v2270_v33  ;;  %v2294_v30 = vld [vmem:[%s6010_s30 + $0x30] sm:$0xff]  ;;  %v2303_v33 = vld [vmem:[%s6010_s30 + $0x78] sm:$0xff] }
 0xdf7   : > { %v4935_v38 = vcombine.high %v2294_v30, %v2302_v31  ;;  %v4937_v40 = vcombine.high %v2295_v32, %v2303_v33  ;;  %v2318_v43 = vld [vmem:[%s6010_s30 + $0xf0] sm:$0xff]  ;;  %v4934_v48 = vcombine.low %v2294_v30, %v2302_v31  ;;  %v4936_v19 = vcombine.low %v2295_v32, %v2303_v33  ;;  %v5644_v30 = vld [vmem:[%s6022_s24 + $0x78] sm:$0xff]  }
 0xdf8   : > { %v6332_v46 = vadd.f32 %v4921_v34, %v2278_v37  ;;  %v4978_v34 = vcombine.low %v2340_v20, %v2348_v21  ;;  %v4980_v37 = vcombine.low %v2341_v22, %v2349_v42  ;;  %v4951_v23 = vcombine.high %v2310_v41, %v2318_v43  ;;  %v5636_v20 = vld [vmem:[%s6022_s24 + $0x68] sm:$0xff]   ;;  %v5645_v31 = vld [vmem:[%s6022_s24 + $0xf8] sm:$0xff]  }
 0xdf9   : > { %v4950_v53 = vcombine.low %v2310_v41, %v2318_v43  ;;  %v5637_v21 = vld [vmem:[%s6022_s24 + $0xe8] sm:$0xff]   ;;  %v5646_v32 = vld [vmem:[%s6022_s24 + $0x38] sm:$0xff]  }
 0xdfa   : > { %v6336_v15 = vpack.c.bf16 %v6332_v46, %v6330_v45  ;;  %v5638_v22 = vld [vmem:[%s6022_s24 + $0x28] sm:$0xff]   ;;  %v5647_v33 = vld [vmem:[%s6022_s24 + $0xb8] sm:$0xff]  }
 0xdfb   : > { %v5639_v42 = vld [vmem:[%s6022_s24 + $0xa8] sm:$0xff]  }
 0xdfc   : > { %4986 = vmatmul.mubr.msk.bf16.vlgmr.msra.gmra.mrb[44].mxu1 %vm1028_vm3, %v6336_v15  ;;  %4987 = vmatmul.mubr.msk.bf16.vlgmr.msra.gmra.mrb[36].mxu0 %vm1028_vm3, %v6336_v15  ;;  %v6438_v43 = vld [vmem:[%s6016_s6 + $0x8] sm:$0xff] }
 0xdfd   : > { %2846 = vmatpush1.bf16.msra.mxu1 %v4926_v12  ;;  %2889 = vmatpush1.bf16.msra.mxu0 %v4928_v17  ;;  %v2333_v12 = vld [vmem:[%s6010_s30 + $0x168] sm:$0xff]  ;;  %v4963_v17 = vcombine.high %v2324_v8, %v2332_v10  ;;  %v5627_v8 = vld [vmem:[%s6022_s24 + $0x90] sm:$0xff]   ;;  %v5629_v10 = vld [vmem:[%s6022_s24 + $0xd8] sm:$0xff]  }
 0xdfe   : > { %2847 = vmatprep.subr.bf16.mxu1 %v4943_v47  ;;  %2890 = vmatprep.subr.bf16.mxu0 %v4945_v44  ;;  %v4965_v18 = vcombine.high %v2325_v11, %v2333_v12  ;;  %v4964_v26 = vcombine.low %v2325_v11, %v2333_v12  ;;  %v2311_v47 = vld [vmem:[%s6010_s30 + $0xb8] sm:$0xff] }
 0xdff   : > { %2877 = vmatprep.mubr.bf16.mxu1 %v5832_v16  ;;  %2920 = vmatprep.mubr.bf16.mxu0 %v5832_v16  ;;  %v2319_v44 = vld [vmem:[%s6010_s30 + $0xf8] sm:$0xff] }
 0xe00   : > { %v4953_v24 = vcombine.high %v2311_v47, %v2319_v44  ;;  %v4952_v27 = vcombine.low %v2311_v47, %v2319_v44  ;;  %v5630_v11 = vld [vmem:[%s6022_s24 + $0x18] sm:$0xff]  }
 0xe01   : > { %2848 = vmatpush1.bf16.msra.mxu1 %v4942_v49  ;;  %2891 = vmatpush1.bf16.msra.mxu0 %v4944_v50  ;;  %v2326_v49 = vld [vmem:[%s6010_s30 + $0x130] sm:$0xff]  ;;  %v5631_v12 = vld [vmem:[%s6022_s24 + $0x98] sm:$0xff]  }
 0xe02   : > { %2849 = vmatprep.subr.bf16.mxu1 %v4959_v51  ;;  %2892 = vmatprep.subr.bf16.mxu0 %v4961_v52  ;;  %v2334_v50 = vld [vmem:[%s6010_s30 + $0x170] sm:$0xff]  ;;  %v2327_v51 = vld [vmem:[%s6010_s30 + $0x138] sm:$0xff] }
 0xe03   : > { %v2335_v52 = vld [vmem:[%s6010_s30 + $0x178] sm:$0xff]  ;;  %v4967_v35 = vcombine.high %v2326_v49, %v2334_v50  ;;  %v4966_v57 = vcombine.low %v2326_v49, %v2334_v50 }
 0xe04   : > { %v4969_v4 = vcombine.high %v2327_v51, %v2335_v52  ;;  %v4968_v58 = vcombine.low %v2327_v51, %v2335_v52 }
 0xe05   : > { %2850 = vmatpush1.bf16.msra.mxu1 %v4958_v54  ;;  %2893 = vmatpush1.bf16.msra.mxu0 %v4960_v39  ;;  %v2342_v54 = vld [vmem:[%s6010_s30 + $0x1b0] sm:$0xff] }
 0xe06   : > { %2851 = vmatprep.subr.bf16.mxu1 %v4975_v55  ;;  %2894 = vmatprep.subr.bf16.mxu0 %v4977_v56  ;;  %v2350_v39 = vld [vmem:[%s6010_s30 + $0x1f0] sm:$0xff]  ;;  %v2343_v55 = vld [vmem:[%s6010_s30 + $0x1b8] sm:$0xff] }
 0xe07   : > { %v2351_v56 = vld [vmem:[%s6010_s30 + $0x1f8] sm:$0xff]  ;;  %v4983_v59 = vcombine.high %v2342_v54, %v2350_v39 }
 0xe08   : > { %v4985_v60 = vcombine.high %v2343_v55, %v2351_v56 }
 0xe09   : > { %2852 = vmatpush1.bf16.msra.mxu1 %v4974_v61  ;;  %2895 = vmatpush1.bf16.msra.mxu0 %v4976_v62  ;;  %v4982_v61 = vcombine.low %v2342_v54, %v2350_v39  ;;  %v4984_v62 = vcombine.low %v2343_v55, %v2351_v56 }
 0xe0a   : > { %2931 = vmatprep.subr.bf16.mxu1 %v4931_v63  ;;  %2974 = vmatprep.subr.bf16.mxu0 %v4933_v0  ;;  %v5617_v63 = vld [vmem:[%s6022_s24 + $0xc0] sm:$0xff]  }
 0xe0b   : > { %v5618_v0 = vld [vmem:[%s6022_s24] sm:$0xff]  }
 0xe0c   : > { %4988 = vmatmul.mubr.msk.bf16.vlgmr.msra.gmra.mrb[48].mxu1 %vm1028_vm3, %v6336_v15  ;;  %4989 = vmatmul.mubr.msk.bf16.vlgmr.msra.gmra.mrb[40].mxu0 %vm1028_vm3, %v6336_v15 }
 0xe0d   : > { %2932 = vmatpush1.bf16.msra.mxu1 %v4930_v5  ;;  %2975 = vmatpush1.bf16.msra.mxu0 %v4932_v6  ;;  %v5623_v5 = vld [vmem:[%s6022_s24 + $0x88] sm:$0xff]   ;;  %v5624_v6 = vld [vmem:[%s6022_s24 + $0x50] sm:$0xff]  }
 0xe0e   : > { %2933 = vmatprep.subr.bf16.mxu1 %v4947_v9  ;;  %2976 = vmatprep.subr.bf16.mxu0 %v4949_v7  ;;  %v5625_v9 = vld [vmem:[%s6022_s24 + $0xd0] sm:$0xff]  }
 0xe0f   : > { %2963 = vmatprep.mubr.bf16.mxu1 %v5832_v16  ;;  %3006 = vmatprep.mubr.bf16.mxu0 %v5832_v16  ;;  %v5626_v7 = vld [vmem:[%s6022_s24 + $0x10] sm:$0xff]  }
 0xe11   : > { %2934 = vmatpush1.bf16.msra.mxu1 %v4946_v13  ;;  %2977 = vmatpush1.bf16.msra.mxu0 %v4948_v14  ;;  %v5632_v13 = vld [vmem:[%s6022_s24 + $0x60] sm:$0xff]  }
 0xe12   : > { %2935 = vmatprep.subr.bf16.mxu1 %v4963_v17  ;;  %2978 = vmatprep.subr.bf16.mxu0 %v4965_v18  ;;  %v5633_v14 = vld [vmem:[%s6022_s24 + $0xe0] sm:$0xff]  }
 0xe13   : > { %v5634_v17 = vld [vmem:[%s6022_s24 + $0x20] sm:$0xff]  }
 0xe14   : > { %v5635_v18 = vld [vmem:[%s6022_s24 + $0xa0] sm:$0xff]  }
 0xe15   : > { %2936 = vmatpush1.bf16.msra.mxu1 %v4962_v25  ;;  %2979 = vmatpush1.bf16.msra.mxu0 %v4964_v26  ;;  %v5640_v25 = vld [vmem:[%s6022_s24 + $0x70] sm:$0xff]  }
 0xe16   : > { %2937 = vmatprep.subr.bf16.mxu1 %v4979_v29  ;;  %2980 = vmatprep.subr.bf16.mxu0 %v4981_v28  ;;  %v5641_v26 = vld [vmem:[%s6022_s24 + $0xf0] sm:$0xff]  }
 0xe17   : > { %v5642_v29 = vld [vmem:[%s6022_s24 + $0x30] sm:$0xff]  }
 0xe18   : > { %v5643_v28 = vld [vmem:[%s6022_s24 + $0xb0] sm:$0xff]  }
 0xe19   : > { %2938 = vmatpush1.bf16.msra.mxu1 %v4978_v34  ;;  %2981 = vmatpush1.bf16.msra.mxu0 %v4980_v37  ;;  %v5648_v34 = vld [vmem:[%s6022_s24 + $0x140] sm:$0xff]  }
 0xe1a   : > { %3017 = vmatprep.subr.bf16.mxu1 %v4935_v38  ;;  %3060 = vmatprep.subr.bf16.mxu0 %v4937_v40  ;;  %v5649_v37 = vld [vmem:[%s6022_s24 + $0x1c0] sm:$0xff]   ;;  %v2356_v38 = vlaneseq }
 0xe1c   : > { %4990 = vmatmul.mubr.msk.bf16.vlgmr.msra.gmra.mrb[52].mxu1 %vm1028_vm3, %v6336_v15  ;;  %4991 = vmatmul.mubr.msk.bf16.vlgmr.msra.gmra.mrb[44].mxu0 %vm1028_vm3, %v6336_v15  ;;  %v6434_v40 = vshrl.u32 %v2356_v38, 7 }
 0xe1d   : > { %3018 = vmatpush1.bf16.msra.mxu1 %v4934_v48  ;;  %3061 = vmatpush1.bf16.msra.mxu0 %v4936_v19  ;;  %v2352_v19 = vld [vmem:[%s6016_s6] sm:$0xff] }
 0xe1e   : > { %3019 = vmatprep.subr.bf16.mxu1 %v4951_v23  ;;  %3062 = vmatprep.subr.bf16.mxu0 %v4953_v24  ;;  %v2382_v41 = vsub.s32 6, %v6434_v40  ;;  %v2358_v44 = vsub.s32 0, %v6434_v40  ;;  %v2366_v48 = vsub.s32 2, %v6434_v40  ;;  %v2362_v23 = vsub.s32 1, %v6434_v40 }
 0xe1f   : > { %3049 = vmatprep.mubr.bf16.mxu1 %v5832_v16  ;;  %3092 = vmatprep.mubr.bf16.mxu0 %v5832_v16  ;;  %v5616_v16 = vld [vmem:[%s6022_s24 + $0x40] sm:$0xff]   ;;  %v2370_v24 = vsub.s32 3, %v6434_v40 }
 0xe20   : > { %v6441_v47 = vrot.slane %v6438_v43, %v2382_v41  ;;  %v2359_v49 = vrot.slane %v2352_v19, %v2358_v44  ;;  %v2367_v50 = vrot.slane %v2352_v19, %v2366_v48  ;;  %v2363_v51 = vrot.slane %v2352_v19, %v2362_v23 }
 0xe21   : > { %3020 = vmatpush1.bf16.msra.mxu1 %v4950_v53  ;;  %3063 = vmatpush1.bf16.msra.mxu0 %v4952_v27  ;;  %v2371_v52 = vrot.slane %v2352_v19, %v2370_v24 }
 0xe22   : > { %3021 = vmatprep.subr.bf16.mxu1 %v4967_v35  ;;  %3064 = vmatprep.subr.bf16.mxu0 %v4969_v4 }
 0xe25   : > { %3022 = vmatpush1.bf16.msra.mxu1 %v4966_v57  ;;  %3065 = vmatpush1.bf16.msra.mxu0 %v4968_v58 }
 0xe26   : > { %3023 = vmatprep.subr.bf16.mxu1 %v4983_v59  ;;  %3066 = vmatprep.subr.bf16.mxu0 %v4985_v60 }
 0xe29   : > { %3024 = vmatpush1.bf16.msra.mxu1 %v4982_v61  ;;  %3067 = vmatpush1.bf16.msra.mxu0 %v4984_v62 }
 0xe2a   : > { %5193 = vmatprep.subr.bf16.mxu1 %v5616_v16  ;;  %5215 = vmatprep.subr.bf16.mxu0 %v5617_v63 }
 0xe2c   : > { %4992 = vmatmul.mubr.msk.bf16.vlgmr.msra.gmra.mrb[56].mxu1 %vm1028_vm3, %v6336_v15  ;;  %4993 = vmatmul.mubr.msk.bf16.vlgmr.msra.gmra.mrb[48].mxu0 %vm1028_vm3, %v6336_v15  ;;  %v5628_v15 = vld [vmem:[%s6022_s24 + $0x58] sm:$0xff]  }
 0xe2d   : > { %5194 = vmatpush3.bf16.msra.mxu1 %v5618_v0  ;;  %5216 = vmatpush3.bf16.msra.mxu0 %v5619_v1 }
 0xe2e   : > { %5195 = vmatprep.subr.bf16.mxu1 %v5620_v36  ;;  %5217 = vmatprep.subr.bf16.mxu0 %v5621_v2 }
 0xe31   : > { %5196 = vmatpush3.bf16.msra.mxu1 %v5622_v3  ;;  %5218 = vmatpush3.bf16.msra.mxu0 %v5623_v5 }
 0xe32   : > { %5197 = vmatprep.subr.bf16.mxu1 %v5624_v6  ;;  %5219 = vmatprep.subr.bf16.mxu0 %v5625_v9 }
 0xe35   : > { %5198 = vmatpush3.bf16.msra.mxu1 %v5626_v7  ;;  %5220 = vmatpush3.bf16.msra.mxu0 %v5627_v8 }
 0xe36   : > { %5199 = vmatprep.subr.bf16.mxu1 %v5628_v15  ;;  %5221 = vmatprep.subr.bf16.mxu0 %v5629_v10 }
 0xe39   : > { %5200 = vmatpush3.bf16.msra.mxu1 %v5630_v11  ;;  %5222 = vmatpush3.bf16.msra.mxu0 %v5631_v12  ;;  %v5650_v11 = vld [vmem:[%s6022_s24 + $0x100] sm:$0xff]  }
 0xe3a   : > { %5201 = vmatprep.subr.bf16.mxu1 %v5632_v13  ;;  %5223 = vmatprep.subr.bf16.mxu0 %v5633_v14  ;;  %v5651_v12 = vld [vmem:[%s6022_s24 + $0x180] sm:$0xff]   ;;  %v5652_v13 = vld [vmem:[%s6022_s24 + $0x148] sm:$0xff]  }
 0xe3b   : > { %v5653_v14 = vld [vmem:[%s6022_s24 + $0x1c8] sm:$0xff]  }
 0xe3d   : > { %5202 = vmatpush3.bf16.msra.mxu1 %v5634_v17  ;;  %5224 = vmatpush3.bf16.msra.mxu0 %v5635_v18  ;;  %v2374_v17 = vsub.s32 4, %v6434_v40  ;;  %v2378_v18 = vsub.s32 5, %v6434_v40 }
 0xe3e   : > { %5203 = vmatprep.subr.bf16.mxu1 %v5636_v20  ;;  %5225 = vmatprep.subr.bf16.mxu0 %v5637_v21  ;;  %v2386_v20 = vsub.s32 7, %v6434_v40  ;;  %v5654_v21 = vld [vmem:[%s6022_s24 + $0x108] sm:$0xff]  }
 0xe41   : > { %5204 = vmatpush3.bf16.msra.mxu1 %v5638_v22  ;;  %5226 = vmatpush3.bf16.msra.mxu0 %v5639_v42  ;;  %v5655_v22 = vld [vmem:[%s6022_s24 + $0x188] sm:$0xff]   ;;  %v2375_v42 = vrot.slane %v2352_v19, %v2374_v17 }
 0xe42   : > { %5205 = vmatprep.subr.bf16.mxu1 %v5640_v25  ;;  %5227 = vmatprep.subr.bf16.mxu0 %v5641_v26  ;;  %v2383_v25 = vrot.slane %v2352_v19, %v2382_v41  ;;  %v5656_v26 = vld [vmem:[%s6022_s24 + $0x150] sm:$0xff]  }
 0xe45   : > { %5206 = vmatpush3.bf16.msra.mxu1 %v5642_v29  ;;  %5228 = vmatpush3.bf16.msra.mxu0 %v5643_v28  ;;  %v5657_v29 = vld [vmem:[%s6022_s24 + $0x1d0] sm:$0xff]   ;;  %v2379_v28 = vrot.slane %v2352_v19, %v2378_v18 }
 0xe46   : > { %5207 = vmatprep.subr.bf16.mxu1 %v5644_v30  ;;  %5229 = vmatprep.subr.bf16.mxu0 %v5645_v31  ;;  %v2387_v30 = vrot.slane %v2352_v19, %v2386_v20 }
 0xe49   : > { %5208 = vmatpush3.bf16.msra.mxu1 %v5646_v32  ;;  %5230 = vmatpush3.bf16.msra.mxu0 %v5647_v33  ;;  %v5658_v33 = vld [vmem:[%s6022_s24 + $0x110] sm:$0xff]  }
 0xe4a   : > { %5237 = vmatprep.subr.bf16.mxu1 %v5648_v34  ;;  %5259 = vmatprep.subr.bf16.mxu0 %v5649_v37  ;;  %v5659_v34 = vld [vmem:[%s6022_s24 + $0x190] sm:$0xff]  }
 0xecf   : > { %v2793_v53 = vpop.f32.mrb[44].mxu1  ;;  %v2836_v27 = vpop.f32.mrb[36].mxu0 }
 0xed0   : > { %v2794_v35 = vadd.f32 %v2793_v53, %v2359_v49  ;;  %v2837_v4 = vadd.f32 %v2836_v27, %v2367_v50  ;;  %v2795_v54 = vpop.f32.mrb[45].mxu1  ;;  %v2838_v39 = vpop.f32.mrb[37].mxu0 }
 0xed1   : > { %v2796_v55 = vadd.f32 %v2795_v54, %v2363_v51  ;;  %v2839_v56 = vadd.f32 %v2838_v39, %v2371_v52  ;;  %v2797_v57 = vpop.f32.mrb[46].mxu1  ;;  %v2840_v58 = vpop.f32.mrb[38].mxu0 }
 0xed2   : > { %v2798_v59 = vadd.f32 %v2797_v57, %v2359_v49  ;;  %v2841_v60 = vadd.f32 %v2840_v58, %v2367_v50  ;;  %v2799_v61 = vpop.f32.mrb[47].mxu1  ;;  %v2842_v62 = vpop.f32.mrb[39].mxu0  ;;  %v3103_v0 = vmax.f32 %v2794_v35, 0.0  ;;  %v3105_v1 = vmax.f32 %v2837_v4, 0.0  ;;  %v5660_v50 = vld [vmem:[%s6022_s24 + $0x158] sm:$0xff]  }
 0xed3   : > { %v2800_v16 = vadd.f32 %v2799_v61, %v2363_v51  ;;  %v2843_v63 = vadd.f32 %v2842_v62, %v2371_v52  ;;  %v3104_v3 = vmax.f32 %v2796_v55, 0.0  ;;  %v3106_v5 = vmax.f32 %v2839_v56, 0.0  ;;  %v5661_v51 = vld [vmem:[%s6022_s24 + $0x1d8] sm:$0xff]  }
 0xed4   : > { %v3119_v36 = vmax.f32 %v2798_v59, 0.0  ;;  %v3121_v2 = vmax.f32 %v2841_v60, 0.0  ;;  %v5662_v57 = vld [vmem:[%s6022_s24 + $0x118] sm:$0xff]  }
 0xed5   : > { %v3120_v6 = vmax.f32 %v2800_v16, 0.0  ;;  %v3122_v9 = vmax.f32 %v2843_v63, 0.0  ;;  %v5663_v58 = vld [vmem:[%s6022_s24 + $0x198] sm:$0xff]   ;;  %v5664_v16 = vld [vmem:[%s6022_s24 + $0x160] sm:$0xff]  }
 0xed6   : > { %v3135_v7 = vpack.c.bf16 %v3119_v36, %v3103_v0  ;;  %v3137_v8 = vpack.c.bf16 %v3121_v2, %v3105_v1  ;;  %v5665_v63 = vld [vmem:[%s6022_s24 + $0x1e0] sm:$0xff]  }
 0xed7   : > { %v3136_v15 = vpack.c.bf16 %v3120_v6, %v3104_v3  ;;  %v3138_v10 = vpack.c.bf16 %v3122_v9, %v3106_v5 }
 0xed9   : > { %4214 = vmatprep.mubr.bf16.mxu1 %v3136_v15  ;;  %4255 = vmatprep.mubr.bf16.mxu0 %v3138_v10  ;;  %v5668_v15 = vld [vmem:[%s6022_s24 + $0x168] sm:$0xff]  }
 0xeda   : > { %4215 = vmatmul.mubr.bf16.vlgmr.msra.gmra.mrb[60].mxu1 %v3135_v7  ;;  %4256 = vmatmul.mubr.bf16.vlgmr.msra.gmra.mrb[52].mxu0 %v3137_v8  ;;  %v5666_v7 = vld [vmem:[%s6022_s24 + $0x120] sm:$0xff]   ;;  %v5669_v10 = vld [vmem:[%s6022_s24 + $0x1e8] sm:$0xff]  }
 0xedb   : > { %5238 = vmatpush3.bf16.msra.mxu1 %v5650_v11  ;;  %5260 = vmatpush3.bf16.msra.mxu0 %v5651_v12  ;;  %v5667_v8 = vld [vmem:[%s6022_s24 + $0x1a0] sm:$0xff]   ;;  %v5670_v11 = vld [vmem:[%s6022_s24 + $0x128] sm:$0xff]  }
 0xedc   : > { %5239 = vmatprep.subr.bf16.mxu1 %v5652_v13  ;;  %5261 = vmatprep.subr.bf16.mxu0 %v5653_v14  ;;  %v5671_v12 = vld [vmem:[%s6022_s24 + $0x1a8] sm:$0xff]   ;;  %v2391_v13 = vrot.slane %v6438_v43, %v2358_v44  ;;  %v2399_v14 = vrot.slane %v6438_v43, %v2366_v48  ;;  %v5674_v44 = vld [vmem:[%s6022_s24 + $0x130] sm:$0xff]  }
 0xedf   : > { %v2879_v31 = vpop.f32.mrb[48].mxu1  ;;  %v2922_v32 = vpop.f32.mrb[40].mxu0  ;;  %5240 = vmatpush3.bf16.msra.mxu1 %v5654_v21  ;;  %5262 = vmatpush3.bf16.msra.mxu0 %v5655_v22  ;;  %v5672_v21 = vld [vmem:[%s6022_s24 + $0x170] sm:$0xff]  }
 0xee0   : > { %v2880_v37 = vadd.f32 %v2879_v31, %v2375_v42  ;;  %v2923_v38 = vadd.f32 %v2922_v32, %v2383_v25  ;;  %v2881_v49 = vpop.f32.mrb[49].mxu1  ;;  %v2924_v41 = vpop.f32.mrb[41].mxu0  ;;  %5241 = vmatprep.subr.bf16.mxu1 %v5656_v26  ;;  %5263 = vmatprep.subr.bf16.mxu0 %v5657_v29  ;;  %v5673_v22 = vld [vmem:[%s6022_s24 + $0x1f0] sm:$0xff]  }
 0xee1   : > { %v2882_v52 = vadd.f32 %v2881_v49, %v2379_v28  ;;  %v2925_v53 = vadd.f32 %v2924_v41, %v2387_v30  ;;  %v2883_v27 = vpop.f32.mrb[50].mxu1  ;;  %v2926_v19 = vpop.f32.mrb[42].mxu0 }
 0xee2   : > { %v2884_v35 = vadd.f32 %v2883_v27, %v2375_v42  ;;  %v2927_v4 = vadd.f32 %v2926_v19, %v2383_v25  ;;  %v2885_v54 = vpop.f32.mrb[51].mxu1  ;;  %v2928_v39 = vpop.f32.mrb[43].mxu0  ;;  %v3107_v59 = vmax.f32 %v2880_v37, 0.0  ;;  %v3109_v60 = vmax.f32 %v2923_v38, 0.0  ;;  %v5678_v27 = vld [vmem:[%s6022_s24 + $0x138] sm:$0xff]  }
 0xee3   : > { %v2886_v55 = vadd.f32 %v2885_v54, %v2379_v28  ;;  %v2929_v56 = vadd.f32 %v2928_v39, %v2387_v30  ;;  %5242 = vmatpush3.bf16.msra.mxu1 %v5658_v33  ;;  %5264 = vmatpush3.bf16.msra.mxu0 %v5659_v34  ;;  %v3108_v0 = vmax.f32 %v2882_v52, 0.0  ;;  %v3110_v1 = vmax.f32 %v2925_v53, 0.0  ;;  %v5675_v28 = vld [vmem:[%s6022_s24 + $0x1b0] sm:$0xff]   ;;  %v5676_v33 = vld [vmem:[%s6022_s24 + $0x178] sm:$0xff]  }
 0xee4   : > { %v3123_v61 = vmax.f32 %v2884_v35, 0.0  ;;  %v3125_v62 = vmax.f32 %v2927_v4, 0.0  ;;  %5243 = vmatprep.subr.bf16.mxu1 %v5660_v50  ;;  %5265 = vmatprep.subr.bf16.mxu0 %v5661_v51  ;;  %v2395_v42 = vrot.slane %v6438_v43, %v2362_v23  ;;  %v2403_v25 = vrot.slane %v6438_v43, %v2370_v24  ;;  %v5677_v23 = vld [vmem:[%s6022_s24 + $0x1f8] sm:$0xff]  }
 0xee5   : > { %v3124_v36 = vmax.f32 %v2886_v55, 0.0  ;;  %v3126_v2 = vmax.f32 %v2929_v56, 0.0  ;;  %v5679_v19 = vld [vmem:[%s6022_s24 + $0x1b8] sm:$0xff]   ;;  %v5680_v55 = vld [vmem:[%s6022_s24 + $0x240] sm:$0xff]  }
 0xee6   : > { %v6481_v3 = vpack.c.bf16 %v3123_v61, %v3107_v59  ;;  %v6483_v5 = vpack.c.bf16 %v3125_v62, %v3109_v60  ;;  %v5681_v56 = vld [vmem:[%s6022_s24 + $0x2c0] sm:$0xff]  }
 0xee7   : > { %v3140_v6 = vpack.c.bf16 %v3124_v36, %v3108_v0  ;;  %v3142_v9 = vpack.c.bf16 %v3126_v2, %v3110_v1  ;;  %5244 = vmatpush3.bf16.msra.mxu1 %v5662_v57  ;;  %5266 = vmatpush3.bf16.msra.mxu0 %v5663_v58  ;;  %v5682_v0 = vld [vmem:[%s6022_s24 + $0x200] sm:$0xff]   ;;  %v5684_v36 = vld [vmem:[%s6022_s24 + $0x248] sm:$0xff]  }
 0xee8   : > { %5245 = vmatprep.subr.bf16.mxu1 %v5664_v16  ;;  %5267 = vmatprep.subr.bf16.mxu0 %v5665_v63  ;;  %v5683_v1 = vld [vmem:[%s6022_s24 + $0x280] sm:$0xff]   ;;  %v5685_v2 = vld [vmem:[%s6022_s24 + $0x2c8] sm:$0xff]  }
 0xee9   : > { %4296 = vmatprep.mubr.bf16.mxu1 %v3140_v6  ;;  %4337 = vmatprep.mubr.bf16.mxu0 %v3142_v9  ;;  %v5686_v6 = vld [vmem:[%s6022_s24 + $0x208] sm:$0xff]   ;;  %v2407_v9 = vrot.slane %v6438_v43, %v2374_v17  ;;  %v5690_v17 = vld [vmem:[%s6022_s24 + $0x210] sm:$0xff]  }
 0xeeb   : > { %5246 = vmatpush3.bf16.msra.mxu1 %v5666_v7  ;;  %5268 = vmatpush3.bf16.msra.mxu0 %v5667_v8  ;;  %v5687_v7 = vld [vmem:[%s6022_s24 + $0x288] sm:$0xff]   ;;  %v5688_v8 = vld [vmem:[%s6022_s24 + $0x250] sm:$0xff]  }
 0xeec   : > { %5247 = vmatprep.subr.bf16.mxu1 %v5668_v15  ;;  %5269 = vmatprep.subr.bf16.mxu0 %v5669_v10  ;;  %v5689_v15 = vld [vmem:[%s6022_s24 + $0x2d0] sm:$0xff]  }
 0xeef   : > { %v2965_v26 = vpop.f32.mrb[52].mxu1  ;;  %v3008_v29 = vpop.f32.mrb[44].mxu0  ;;  %5248 = vmatpush3.bf16.msra.mxu1 %v5670_v11  ;;  %5270 = vmatpush3.bf16.msra.mxu0 %v5671_v12 }
 0xef0   : > { %v2966_v30 = vadd.f32 %v2965_v26, %v2391_v13  ;;  %v3009_v48 = vadd.f32 %v3008_v29, %v2399_v14  ;;  %v2967_v31 = vpop.f32.mrb[53].mxu1  ;;  %v3010_v32 = vpop.f32.mrb[45].mxu0  ;;  %5249 = vmatprep.subr.bf16.mxu1 %v5672_v21  ;;  %5271 = vmatprep.subr.bf16.mxu0 %v5673_v22  ;;  %v5691_v22 = vld [vmem:[%s6022_s24 + $0x290] sm:$0xff]  }
 0xef1   : > { %v2968_v34 = vadd.f32 %v2967_v31, %v2395_v42  ;;  %v3011_v37 = vadd.f32 %v3010_v32, %v2403_v25  ;;  %v2969_v38 = vpop.f32.mrb[54].mxu1  ;;  %v3012_v24 = vpop.f32.mrb[46].mxu0  ;;  %v5694_v31 = vld [vmem:[%s6022_s24 + $0x218] sm:$0xff]  }
 0xef2   : > { %v2970_v49 = vadd.f32 %v2969_v38, %v2391_v13  ;;  %v3013_v41 = vadd.f32 %v3012_v24, %v2399_v14  ;;  %v2971_v50 = vpop.f32.mrb[55].mxu1  ;;  %v3014_v51 = vpop.f32.mrb[47].mxu0  ;;  %v3111_v35 = vmax.f32 %v2966_v30, 0.0  ;;  %v3113_v4 = vmax.f32 %v3009_v48, 0.0  ;;  %v5696_v38 = vld [vmem:[%s6022_s24 + $0x260] sm:$0xff]  }
 0xef3   : > { %v2972_v52 = vadd.f32 %v2971_v50, %v2395_v42  ;;  %v3015_v53 = vadd.f32 %v3014_v51, %v2403_v25  ;;  %5250 = vmatpush3.bf16.msra.mxu1 %v5674_v44  ;;  %5272 = vmatpush3.bf16.msra.mxu0 %v5675_v28  ;;  %v3112_v57 = vmax.f32 %v2968_v34, 0.0  ;;  %v3114_v58 = vmax.f32 %v3011_v37, 0.0  ;;  %v5695_v37 = vld [vmem:[%s6022_s24 + $0x298] sm:$0xff]   ;;  %v5697_v50 = vld [vmem:[%s6022_s24 + $0x2e0] sm:$0xff]  }
 0xef4   : > { %v3127_v54 = vmax.f32 %v2970_v49, 0.0  ;;  %v3129_v39 = vmax.f32 %v3013_v41, 0.0  ;;  %5251 = vmatprep.subr.bf16.mxu1 %v5676_v33  ;;  %5273 = vmatprep.subr.bf16.mxu0 %v5677_v23 }
 0xef5   : > { %v3128_v59 = vmax.f32 %v2972_v52, 0.0  ;;  %v3130_v60 = vmax.f32 %v3015_v53, 0.0 }
 0xef6   : > { %v6513_v61 = vpack.c.bf16 %v3127_v54, %v3111_v35  ;;  %v6515_v62 = vpack.c.bf16 %v3129_v39, %v3113_v4  ;;  %v5699_v35 = vld [vmem:[%s6022_s24 + $0x2a0] sm:$0xff]   ;;  %v5700_v4 = vld [vmem:[%s6022_s24 + $0x268] sm:$0xff]  }
 0xef7   : > { %v3144_v16 = vpack.c.bf16 %v3128_v59, %v3112_v57  ;;  %v3146_v63 = vpack.c.bf16 %v3130_v60, %v3114_v58  ;;  %5252 = vmatpush3.bf16.msra.mxu1 %v5678_v27  ;;  %5274 = vmatpush3.bf16.msra.mxu0 %v5679_v19  ;;  %v5698_v19 = vld [vmem:[%s6022_s24 + $0x220] sm:$0xff]   ;;  %v5701_v54 = vld [vmem:[%s6022_s24 + $0x2e8] sm:$0xff]   ;;  %v5705_v57 = vld [vmem:[%s6022_s24 + $0x2f0] sm:$0xff]  }
 0xef8   : > { %5281 = vmatprep.subr.bf16.mxu1 %v5680_v55  ;;  %5303 = vmatprep.subr.bf16.mxu0 %v5681_v56  ;;  %v5702_v39 = vld [vmem:[%s6022_s24 + $0x228] sm:$0xff]   ;;  %v5704_v56 = vld [vmem:[%s6022_s24 + $0x270] sm:$0xff]   ;;  %v5708_v60 = vld [vmem:[%s6022_s24 + $0x278] sm:$0xff]  }
 0xef9   : > { %v5703_v55 = vld [vmem:[%s6022_s24 + $0x2a8] sm:$0xff]   ;;  %v5706_v58 = vld [vmem:[%s6022_s24 + $0x230] sm:$0xff]  }
 0xefa   : > { %4297 = vmatmul.mubr.bf16.vlgmr.msra.gmra.mrb[64].mxu1 %v6481_v3  ;;  %4338 = vmatmul.mubr.bf16.vlgmr.msra.gmra.mrb[56].mxu0 %v6483_v5  ;;  %v2411_v3 = vrot.slane %v6438_v43, %v2378_v18  ;;  %v2419_v5 = vrot.slane %v6438_v43, %v2386_v20  ;;  %v5692_v18 = vld [vmem:[%s6022_s24 + $0x258] sm:$0xff]   ;;  %v5707_v59 = vld [vmem:[%s6022_s24 + $0x2b0] sm:$0xff]  }
 0xefb   : > { %5282 = vmatpush3.bf16.msra.mxu1 %v5682_v0  ;;  %4378 = vmatprep.mubr.bf16.mxu1 %v3144_v16  ;;  %v5693_v20 = vld [vmem:[%s6022_s24 + $0x2d8] sm:$0xff]  }
 0xefc   : > { %5304 = vmatpush3.bf16.msra.mxu0 %v5683_v1  ;;  %4419 = vmatprep.mubr.bf16.mxu0 %v3146_v63  ;;  %v5709_v16 = vld [vmem:[%s6022_s24 + $0x2f8] sm:$0xff]   ;;  %v5712_v1 = vld [vmem:[%s6022_s24 + $0x340] sm:$0xff]  }
 0xefd   : > { %5283 = vmatprep.subr.bf16.mxu1 %v5684_v36  ;;  %5305 = vmatprep.subr.bf16.mxu0 %v5685_v2  ;;  %v5710_v63 = vld [vmem:[%s6022_s24 + $0x238] sm:$0xff]   ;;  %v5713_v36 = vld [vmem:[%s6022_s24 + $0x3c0] sm:$0xff]  }
 0xefe   : > { %v5711_v0 = vld [vmem:[%s6022_s24 + $0x2b8] sm:$0xff]   ;;  %v5714_v2 = vld [vmem:[%s6022_s24 + $0x300] sm:$0xff]  }
 0xeff   : > { %v3051_v10 = vpop.f32.mrb[56].mxu1  ;;  %v3094_v11 = vpop.f32.mrb[48].mxu0  ;;  %5284 = vmatpush3.bf16.msra.mxu1 %v5686_v6  ;;  %v5715_v6 = vld [vmem:[%s6022_s24 + $0x380] sm:$0xff]  }
 0xf00   : > { %v3052_v12 = vadd.f32 %v3051_v10, %v2407_v9  ;;  %v3095_v13 = vadd.f32 %v3094_v11, %v6441_v47  ;;  %5306 = vmatpush3.bf16.msra.mxu0 %v5687_v7  ;;  %v3053_v14 = vpop.f32.mrb[57].mxu1  ;;  %v3096_v21 = vpop.f32.mrb[49].mxu0  ;;  %5285 = vmatprep.subr.bf16.mxu1 %v5688_v8  ;;  %v5717_v7 = vld [vmem:[%s6022_s24 + $0x3c8] sm:$0xff]   ;;  %v5724_v10 = vld [vmem:[%s6022_s24 + $0x358] sm:$0xff]  }
 0xf01   : > { %v3054_v42 = vadd.f32 %v3053_v14, %v2411_v3  ;;  %v3097_v40 = vadd.f32 %v3096_v21, %v2419_v5  ;;  %v3055_v25 = vpop.f32.mrb[58].mxu1  ;;  %v3098_v43 = vpop.f32.mrb[50].mxu0  ;;  %5307 = vmatprep.subr.bf16.mxu0 %v5689_v15  ;;  %v5718_v8 = vld [vmem:[%s6022_s24 + $0x308] sm:$0xff]   ;;  %v5721_v15 = vld [vmem:[%s6022_s24 + $0x3d0] sm:$0xff]   ;;  %v5725_v11 = vld [vmem:[%s6022_s24 + $0x3d8] sm:$0xff]  }
 0xf02   : > { %v3056_v26 = vadd.f32 %v3055_v25, %v2407_v9  ;;  %v3099_v29 = vadd.f32 %v3098_v43, %v6441_v47  ;;  %v3057_v44 = vpop.f32.mrb[59].mxu1  ;;  %v3100_v28 = vpop.f32.mrb[51].mxu0  ;;  %v3115_v32 = vmax.f32 %v3052_v12, 0.0  ;;  %v3117_v33 = vmax.f32 %v3095_v13, 0.0  ;;  %v5716_v9 = vld [vmem:[%s6022_s24 + $0x348] sm:$0xff]   ;;  %v5727_v12 = vld [vmem:[%s6022_s24 + $0x398] sm:$0xff]  }
 0xf03   : > { %v3058_v30 = vadd.f32 %v3057_v44, %v2411_v3  ;;  %v3101_v48 = vadd.f32 %v3100_v28, %v2419_v5  ;;  %5286 = vmatpush3.bf16.msra.mxu1 %v5690_v17  ;;  %v3116_v24 = vmax.f32 %v3054_v42, 0.0  ;;  %v3118_v47 = vmax.f32 %v3097_v40, 0.0  ;;  %v5719_v3 = vld [vmem:[%s6022_s24 + $0x388] sm:$0xff]   ;;  %v5720_v5 = vld [vmem:[%s6022_s24 + $0x350] sm:$0xff]   ;;  %v5726_v17 = vld [vmem:[%s6022_s24 + $0x318] sm:$0xff]  }
 0xf04   : > { %v3131_v23 = vmax.f32 %v3056_v26, 0.0  ;;  %v3133_v34 = vmax.f32 %v3099_v29, 0.0  ;;  %5308 = vmatpush3.bf16.msra.mxu0 %v5691_v22  ;;  %5287 = vmatprep.subr.bf16.mxu1 %v5692_v18  ;;  %v5728_v13 = vld [vmem:[%s6022_s24 + $0x360] sm:$0xff]   ;;  %v5732_v18 = vld [vmem:[%s6022_s24 + $0x368] sm:$0xff]   ;;  %v5736_v43 = vld [vmem:[%s6022_s24 + $0x370] sm:$0xff]  }
 0xf05   : > { %v3132_v49 = vmax.f32 %v3058_v30, 0.0  ;;  %v3134_v41 = vmax.f32 %v3101_v48, 0.0  ;;  %5309 = vmatprep.subr.bf16.mxu0 %v5693_v20  ;;  %v5729_v14 = vld [vmem:[%s6022_s24 + $0x3e0] sm:$0xff]   ;;  %v5733_v42 = vld [vmem:[%s6022_s24 + $0x3e8] sm:$0xff]   ;;  %v5737_v20 = vld [vmem:[%s6022_s24 + $0x3f0] sm:$0xff]  }
 0xf06   : > { %v6546_v51 = vpack.c.bf16 %v3131_v23, %v3115_v32  ;;  %v6548_v52 = vpack.c.bf16 %v3133_v34, %v3117_v33  ;;  %v5730_v21 = vld [vmem:[%s6022_s24 + $0x320] sm:$0xff]   ;;  %v5734_v40 = vld [vmem:[%s6022_s24 + $0x328] sm:$0xff]   ;;  %v5738_v26 = vld [vmem:[%s6022_s24 + $0x330] sm:$0xff]  }
 0xf07   : > { %v3148_v53 = vpack.c.bf16 %v3132_v49, %v3116_v24  ;;  %v3150_v27 = vpack.c.bf16 %v3134_v41, %v3118_v47  ;;  %5288 = vmatpush3.bf16.msra.mxu1 %v5694_v31  ;;  %v5731_v22 = vld [vmem:[%s6022_s24 + $0x3a0] sm:$0xff]   ;;  %v5735_v25 = vld [vmem:[%s6022_s24 + $0x3a8] sm:$0xff]   ;;  %v5739_v29 = vld [vmem:[%s6022_s24 + $0x3b0] sm:$0xff]  }
 0xf08   : > { %5310 = vmatpush3.bf16.msra.mxu0 %v5695_v37  ;;  %5289 = vmatprep.subr.bf16.mxu1 %v5696_v38  ;;  %v5740_v44 = vld [vmem:[%s6022_s24 + $0x378] sm:$0xff]   ;;  %v4994_v33 = vld [vmem:[%s879_s28] ss:$0 sm:$0xff] }
 0xf09   : > { %5311 = vmatprep.subr.bf16.mxu0 %v5697_v50  ;;  %v5741_v28 = vld [vmem:[%s6022_s24 + $0x3f8] sm:$0xff]  }
 0xf0a   : > { %v5742_v30 = vld [vmem:[%s6022_s24 + $0x338] sm:$0xff]  }
 0xf0b   : > { %5290 = vmatpush3.bf16.msra.mxu1 %v5698_v19  ;;  %v5743_v48 = vld [vmem:[%s6022_s24 + $0x3b8] sm:$0xff]  }
 0xf0c   : > { %5312 = vmatpush3.bf16.msra.mxu0 %v5699_v35  ;;  %5291 = vmatprep.subr.bf16.mxu1 %v5700_v4 }
 0xf0d   : > { %5313 = vmatprep.subr.bf16.mxu0 %v5701_v54 }
 0xf0f   : > { %5292 = vmatpush3.bf16.msra.mxu1 %v5702_v39 }
 0xf10   : > { %5314 = vmatpush3.bf16.msra.mxu0 %v5703_v55  ;;  %5293 = vmatprep.subr.bf16.mxu1 %v5704_v56 }
 0xf11   : > { %5315 = vmatprep.subr.bf16.mxu0 %v5705_v57 }
 0xf13   : > { %5294 = vmatpush3.bf16.msra.mxu1 %v5706_v58 }
 0xf14   : > { %5316 = vmatpush3.bf16.msra.mxu0 %v5707_v59  ;;  %5295 = vmatprep.subr.bf16.mxu1 %v5708_v60 }
 0xf15   : > { %5317 = vmatprep.subr.bf16.mxu0 %v5709_v16 }
 0xf17   : > { %5296 = vmatpush3.bf16.msra.mxu1 %v5710_v63 }
 0xf18   : > { %5318 = vmatpush3.bf16.msra.mxu0 %v5711_v0  ;;  %5325 = vmatprep.subr.bf16.mxu1 %v5712_v1 }
 0xf19   : > { %5347 = vmatprep.subr.bf16.mxu0 %v5713_v36 }
 0xf1a   : > { %4379 = vmatmul.mubr.bf16.vlgmr.msra.gmra.mrb[68].mxu1 %v6513_v61  ;;  %v5722_v61 = vld [vmem:[%s6022_s24 + $0x310] sm:$0xff]  }
 0xf1b   : > { %4420 = vmatmul.mubr.bf16.vlgmr.msra.gmra.mrb[60].mxu0 %v6515_v62  ;;  %5326 = vmatpush3.bf16.msra.mxu1 %v5714_v2  ;;  %v5723_v62 = vld [vmem:[%s6022_s24 + $0x390] sm:$0xff]  }
 0xf1c   : > { %4460 = vmatprep.mubr.bf16.mxu1 %v3148_v53  ;;  %5348 = vmatpush3.bf16.msra.mxu0 %v5715_v6 }
 0xf1d   : > { %4501 = vmatprep.mubr.bf16.mxu0 %v3150_v27  ;;  %5327 = vmatprep.subr.bf16.mxu1 %v5716_v9 }
 0xf1e   : > { %5349 = vmatprep.subr.bf16.mxu0 %v5717_v7 }
 0xf1f   : > { %5328 = vmatpush3.bf16.msra.mxu1 %v5718_v8 }
 0xf20   : > { %5350 = vmatpush3.bf16.msra.mxu0 %v5719_v3  ;;  %5329 = vmatprep.subr.bf16.mxu1 %v5720_v5 }
 0xf21   : > { %5351 = vmatprep.subr.bf16.mxu0 %v5721_v15 }
 0xf23   : > { %5330 = vmatpush3.bf16.msra.mxu1 %v5722_v61 }
 0xf24   : > { %5352 = vmatpush3.bf16.msra.mxu0 %v5723_v62  ;;  %5331 = vmatprep.subr.bf16.mxu1 %v5724_v10 }
 0xf25   : > { %5353 = vmatprep.subr.bf16.mxu0 %v5725_v11 }
 0xf27   : > { %5332 = vmatpush3.bf16.msra.mxu1 %v5726_v17 }
 0xf28   : > { %5354 = vmatpush3.bf16.msra.mxu0 %v5727_v12  ;;  %5333 = vmatprep.subr.bf16.mxu1 %v5728_v13 }
 0xf29   : > { %5355 = vmatprep.subr.bf16.mxu0 %v5729_v14 }
 0xf2b   : > { %5334 = vmatpush3.bf16.msra.mxu1 %v5730_v21 }
 0xf2c   : > { %5356 = vmatpush3.bf16.msra.mxu0 %v5731_v22  ;;  %5335 = vmatprep.subr.bf16.mxu1 %v5732_v18 }
 0xf2d   : > { %5357 = vmatprep.subr.bf16.mxu0 %v5733_v42 }
 0xf2f   : > { %5336 = vmatpush3.bf16.msra.mxu1 %v5734_v40 }
 0xf30   : > { %5358 = vmatpush3.bf16.msra.mxu0 %v5735_v25  ;;  %5337 = vmatprep.subr.bf16.mxu1 %v5736_v43 }
 0xf31   : > { %5359 = vmatprep.subr.bf16.mxu0 %v5737_v20 }
 0xf33   : > { %5338 = vmatpush3.bf16.msra.mxu1 %v5738_v26 }
 0xf34   : > { %5360 = vmatpush3.bf16.msra.mxu0 %v5739_v29  ;;  %5339 = vmatprep.subr.bf16.mxu1 %v5740_v44 }
 0xf35   : > { %5361 = vmatprep.subr.bf16.mxu0 %v5741_v28 }
 0xf37   : > { %5340 = vmatpush3.bf16.msra.mxu1 %v5742_v30 }
 0xf38   : > { %5362 = vmatpush3.bf16.msra.mxu0 %v5743_v48 }
 0xf3a   : > { %4461 = vmatmul.mubr.bf16.vlgmr.msra.gmra.mrb[72].mxu1 %v6546_v51 }
 0xf3b   : > { %4502 = vmatmul.mubr.bf16.vlgmr.msra.gmra.mrb[64].mxu0 %v6548_v52 }
 0xfad   : > { %v5209_v31 = vpop.f32.mrb[60].mxu1  ;;  %v5231_v32 = vpop.f32.mrb[52].mxu0 }
 0xfae   : > { %v5210_v23 = vpop.f32.mrb[61].mxu1  ;;  %v5232_v34 = vpop.f32.mrb[53].mxu0 }
 0xfaf   : > { %v5211_v37 = vadd.f32 %v5210_v23, %v5209_v31  ;;  %v5233_v38 = vadd.f32 %v5232_v34, %v5231_v32  ;;  %v5212_v24 = vpop.f32.mrb[62].mxu1  ;;  %v5234_v47 = vpop.f32.mrb[54].mxu0 }
 0xfb0   : > { %v5213_v49 = vpop.f32.mrb[63].mxu1  ;;  %v5235_v41 = vpop.f32.mrb[55].mxu0 }
 0xfb1   : > { %v4217_v50 = vadd.f32 %v5211_v37, %v4994_v33  ;;  %v5214_v53 = vadd.f32 %v5213_v49, %v5212_v24  ;;  %v5236_v51 = vadd.f32 %v5235_v41, %v5234_v47 }
 0xfb3   : > { %v4258_v27 = vadd.f32 %v5233_v38, %v4217_v50  ;;  %v4220_v52 = vadd.f32 %v5214_v53, %v4994_v33 }
 0xfb5   : > { %v4261_v19 = vadd.f32 %v5236_v51, %v4220_v52 }
 0xfcd   : > { %v5253_v35 = vpop.f32.mrb[64].mxu1  ;;  %v5275_v4 = vpop.f32.mrb[56].mxu0 }
 0xfce   : > { %v5254_v54 = vpop.f32.mrb[65].mxu1  ;;  %v5276_v39 = vpop.f32.mrb[57].mxu0 }
 0xfcf   : > { %v5255_v55 = vadd.f32 %v5254_v54, %v5253_v35  ;;  %v5277_v56 = vadd.f32 %v5276_v39, %v5275_v4  ;;  %v5256_v57 = vpop.f32.mrb[66].mxu1  ;;  %v5278_v58 = vpop.f32.mrb[58].mxu0 }
 0xfd0   : > { %v5257_v59 = vpop.f32.mrb[67].mxu1  ;;  %v5279_v60 = vpop.f32.mrb[59].mxu0 }
 0xfd1   : > { %v4299_v16 = vadd.f32 %v5255_v55, %v4258_v27  ;;  %v5258_v63 = vadd.f32 %v5257_v59, %v5256_v57  ;;  %v5280_v0 = vadd.f32 %v5279_v60, %v5278_v58  ;;  %v5124_v59 = vld [vmem:[%s885_s27] ss:$0 sm:$0xff] }
 0xfd3   : > { %v4340_v1 = vadd.f32 %v5277_v56, %v4299_v16  ;;  %v4302_v36 = vadd.f32 %v5258_v63, %v4261_v19  ;;  %v5123_v56 = vld [vmem:[%s882_s29] ss:$0 sm:$0xff]  ;;  %s6743_s29 = sld [smem:[#allocation14_spill]] (!%p5125_p5) }
 0xfd5   : > { %v4343_v2 = vadd.f32 %v5280_v0, %v4302_v36  ;;  %v4570_v36 = vld [vmem:[%s6742_s22] sm:$0xff] (!%p5125_p5) }
 0xfed   : > { %v5297_v6 = vpop.f32.mrb[68].mxu1 }
 0xfee   : > { %v5319_v9 = vpop.f32.mrb[60].mxu0  ;;  %v5298_v7 = vpop.f32.mrb[69].mxu1 }
 0xfef   : > { %v5299_v8 = vadd.f32 %v5298_v7, %v5297_v6  ;;  %v5320_v3 = vpop.f32.mrb[61].mxu0  ;;  %v5300_v5 = vpop.f32.mrb[70].mxu1  ;;  %v4572_v6 = vld [vmem:[%s6742_s22 + $0x10] sm:$0xff] (!%p5125_p5) }
 0xff0   : > { %v5321_v15 = vadd.f32 %v5320_v3, %v5319_v9  ;;  %v5322_v61 = vpop.f32.mrb[62].mxu0  ;;  %v5301_v62 = vpop.f32.mrb[71].mxu1  ;;  %v5833_v9 = vmov (!%p5125_p5), 0.0|0.0   ;;  %v5835_v3 = vmov (!%p5125_p5), 0.0  }
 0xff1   : > { %v4381_v10 = vadd.f32 %v5299_v8, %v4340_v1  ;;  %v5302_v11 = vadd.f32 %v5301_v62, %v5300_v5  ;;  %v5323_v17 = vpop.f32.mrb[63].mxu0  ;;  %5546 = vmatprep.subr.bf16.mxu0 (!%p5125_p5), %v5833_v9  ;;  %v4573_v8 = vld [vmem:[%s6742_s22 + $0x18] sm:$0xff] (!%p5125_p5)  ;;  %5543 = vmatprep.mubr.msk.f32.mxu0 (!%p5125_p5), %vm5834_vm9, %v5835_v3 }
 0xff2   : > { %v5324_v12 = vadd.f32 %v5323_v17, %v5322_v61  ;;  %v5550_v5 = vpack.c.bf16 (!%p5125_p5), %v4573_v8, %v4572_v6  ;;  %v4575_v61 = vld [vmem:[%s6742_s22 + $0x28] sm:$0xff] (!%p5125_p5) }
 0xff3   : > { %v4422_v13 = vadd.f32 %v5321_v15, %v4381_v10  ;;  %v4384_v14 = vadd.f32 %v5302_v11, %v4343_v2  ;;  %v4571_v2 = vld [vmem:[%s6742_s22 + $0x8] sm:$0xff] (!%p5125_p5)  ;;  %v4574_v15 = vld [vmem:[%s6742_s22 + $0x20] sm:$0xff] (!%p5125_p5)  ;;  %v4576_v10 = vld [vmem:[%s6742_s22 + $0x30] sm:$0xff] (!%p5125_p5) }
 0xff4   : > { %v5547_v7 = vpack.c.bf16 (!%p5125_p5), %v4571_v2, %v4570_v36  ;;  %v5553_v62 = vpack.c.bf16 (!%p5125_p5), %v4575_v61, %v4574_v15  ;;  %v4577_v11 = vld [vmem:[%s6742_s22 + $0x38] sm:$0xff] (!%p5125_p5) }
 0xff5   : > { %v4425_v21 = vadd.f32 %v5324_v12, %v4384_v14  ;;  %v5556_v17 = vpack.c.bf16 (!%p5125_p5), %v4577_v11, %v4576_v10 }
 0xff6   : > { %5548 = vmatpush3.bf16.msra.mxu0 (!%p5125_p5), %v5547_v7 }
 0xff7   : > { %5549 = vmatprep.subr.bf16.mxu0 (!%p5125_p5), %v5833_v9 }
 0xffa   : > { %5551 = vmatpush3.bf16.msra.mxu0 (!%p5125_p5), %v5550_v5 }
 0xffb   : > { %5552 = vmatprep.subr.bf16.mxu0 (!%p5125_p5), %v5833_v9 }
 0xffe   : > { %5554 = vmatpush3.bf16.msra.mxu0 (!%p5125_p5), %v5553_v62 }
 0xfff   : > { %5555 = vmatprep.subr.bf16.mxu0 (!%p5125_p5), %v5833_v9 }
0x1002   : > { %5557 = vmatpush3.bf16.msra.mxu0 (!%p5125_p5), %v5556_v17 }
0x100d   : > { %v5341_v22 = vpop.f32.mrb[72].mxu1 }
0x100e   : > { %v5363_v18 = vpop.f32.mrb[64].mxu0  ;;  %v5342_v42 = vpop.f32.mrb[73].mxu1 }
0x100f   : > { %v5343_v40 = vadd.f32 %v5342_v42, %v5341_v22  ;;  %v5364_v25 = vpop.f32.mrb[65].mxu0  ;;  %v5344_v43 = vpop.f32.mrb[74].mxu1 }
0x1010   : > { %v5365_v20 = vadd.f32 %v5364_v25, %v5363_v18  ;;  %v5366_v26 = vpop.f32.mrb[66].mxu0  ;;  %v5345_v29 = vpop.f32.mrb[75].mxu1 }
0x1011   : > { %v4463_v44 = vadd.f32 %v5343_v40, %v4422_v13  ;;  %v5346_v28 = vadd.f32 %v5345_v29, %v5344_v43  ;;  %v5367_v30 = vpop.f32.mrb[67].mxu0 }
0x1012   : > { %v5368_v48 = vadd.f32 %v5367_v30, %v5366_v26 }
0x1013   : > { %v4504_v31 = vadd.f32 %v5365_v20, %v4463_v44  ;;  %v4466_v32 = vadd.f32 %v5346_v28, %v4425_v21  ;;  %v5126_v21 = vld [vmem:[%s6743_s29] ss:$0 sm:$0xff] (!%p5125_p5) }
0x1015   : > { %v4507_v33 = vadd.f32 %v5368_v48, %v4466_v32  ;;  %v4510_v23 = vadd.f32 %v4504_v31, %v6330_v45 }
0x1017   : > { %v4514_v34 = vsel %vm1028_vm3, %v4510_v23, 0.0  ;;  %v4511_v37 = vadd.f32 %v4507_v33, %v6332_v46 }
0x1018   : > { %4515 = vadd.xlane.f32.xlu1 %v4514_v34 }
0x1019   : > { %v4517_v38 = vsel %vm1028_vm3, %v4511_v37, 0.0 }
0x101a   : > { %4518 = vadd.xlane.f32.xlu0 %v4517_v38 }
0x10a5   : > { %v4516_v24 = vpop.xlane.xlu1 %4515 }
0x10a6   : > { %v4520_v47 = vmul.f32 0.015625, %v4516_v24 }
0x10a7   : > { %v4519_v49 = vpop.xlane.xlu0 %4518 }
0x10a8   : > { %v4522_v41 = vsub.f32 %v4510_v23, %v4520_v47  ;;  %v4521_v50 = vmul.f32 0.015625, %v4519_v49 }
0x10aa   : > { %v4523_v53 = vsub.f32 %v4511_v37, %v4521_v50  ;;  %v4524_v51 = vmul.f32 %v4522_v41, %v4522_v41 }
0x10ac   : > { %v4526_v27 = vsel %vm1028_vm3, %v4524_v51, 0.0  ;;  %v4525_v52 = vmul.f32 %v4523_v53, %v4523_v53 }
0x10ad   : > { %4527 = vadd.xlane.f32.xlu1 %v4526_v27 }
0x10ae   : > { %v4529_v45 = vsel %vm1028_vm3, %v4525_v52, 0.0 }
0x10af   : > { %4530 = vadd.xlane.f32.xlu0 %v4529_v45 }
0x113a   : > { %v4528_v46 = vpop.xlane.xlu1 %4527 }
0x113b   : > { %v4532_v19 = vmul.f32 0.015625, %v4528_v46 }
0x113c   : > { %v4531_v35 = vpop.xlane.xlu0 %4530 }
0x113d   : > { %v4534_v4 = vadd.f32 1e-05, %v4532_v19  ;;  %v4533_v54 = vmul.f32 0.015625, %v4531_v35 }
0x113f   : > { %5780 = vrsqrt.f32 %v4534_v4  ;;  %v4535_v39 = vadd.f32 1e-05, %v4533_v54 }
0x1141   : > { %5782 = vrsqrt.f32 %v4535_v39 }
0x1149   : > { %v5781_v55 = vpop.eup %5780 }
0x114a   : > { %v4538_v57 = vmul.f32 %v5781_v55, %v4522_v41 }
0x114b   : > { %v5783_v58 = vpop.eup %5782 }
0x114c   : > { %v4546_v60 = vmul.f32 %v5123_v56, %v4538_v57  ;;  %v4539_v16 = vmul.f32 %v5783_v58, %v4523_v53  ;;  %4561 = sbr.rel (%p5125_p5) target bundleno = 4652 (0x122c), region = 112 }
0x114e   : > { %v4554_v63 = vadd.f32 %v5124_v59, %v4546_v60  ;;  %v4547_v0 = vmul.f32 %v5123_v56, %v4539_v16 }
0x1150   : > { %4556 = vst.msk [vmem:[#allocation2] sm:$0xff] %vm1028_vm3, %v4554_v63  ;;  %v4555_v1 = vadd.f32 %v5124_v59, %v4547_v0  ;;  %v4563_v12 = vrot.slane (!%p5125_p5), %v4554_v63, 7 }
0x1152   : > { %4557 = vst.msk [vmem:[#allocation2 + $0x8] sm:$0xff] %vm1028_vm3, %v4555_v1  ;;  %v4566_v13 = vrot.slane (!%p5125_p5), %v4555_v1, 6 }
0x1154   : > { %v4569_v14 = vsel %vm4568_vm10, %v4563_v12, %v4566_v13 }
0x1155   : > { %5544 = vmatmul.mubr.msk.f32.vlgmr.msra.gmra.mrb[0].mxu0 %vm1028_vm3, %v4569_v14 }
0x1228   : > { %v4654_v22 = vpop.f32.mrb[0].mxu0 }
0x1229   : > { %v4655_v18 = vadd.f32 %v5126_v21, %v4654_v22  ;;  %v5545_v42 = vpop.f32.mrb[1].mxu0 }
0x122b   : > { %4659 = vst.msk [vmem:[#allocation3] sm:$0x3] %vm4658_vm11, %v4655_v18 }
0x122c PF: > { %p5562_p6 = scmp.eq.s32.totalorder %s5953_s25, 1  ;;  %s5836_s3 = smov [#allocation3]  }
0x122d   : > { %s4667_s11 = sshll.u32 %s5836_s3, 4  ;;  %s4668_s11 = int_to_ptr.vmem [resolvable:$true] %s4667_s11 }
0x122e   : > { %s5786_s21 = scalar_lea.vmem %s4668_s11, 32  ;;  %p5793_p10 = scmp.lt.s32.totalorder %s4668_s11, %s4668_s11 }
0x122f   : > { %p5787_p7 = scmp.ne.s32.totalorder %s4668_s11, %s5786_s21  ;;  %p5794_p11 = scmp.lt.s32.totalorder %s5786_s21, %s5786_s21 }
0x1231   : > { %p5788_p8 = pnand %p5787_p7, %p5562_p6  ;;  %p5795_p12 = por %p5794_p11, %p5793_p10 }
0x1233   : > { %p5789_p9 = pneg %p5788_p8 }
0x1235   : > { %p5796_p13 = pnand %p5795_p12, %p5789_p9 }
0x1237   : > { %5799 = shalt.err (!%p5796_p13)
}
0x1238   : > { %s6744_s0 = sld [smem:[#allocation21_spill]] }
0x123e   : > { %s5800_s4 = scalar_lea.hbm %s6744_s0, 32 }
0x123f   : > { %p5801_p0 = scmp.ne.s32.totalorder %s6744_s0, %s5800_s4  ;;  %p5806_p3 = scmp.lt.u32.totalorder %s5800_s4, %s6744_s0 }
0x1241   : > { %p5802_p1 = pnand %p5801_p0, %p5562_p6 }
0x1243   : > { %p5803_p2 = pneg %p5802_p1 }
0x1245   : > { %p5808_p4 = pnand %p5806_p3, %p5803_p2 }
0x1247   : > { %5811 = shalt.err (!%p5808_p4)
}
0x1248   : > { %5559 = dma.vmem_to_hbm [thread:$0]  (%p5562_p6), %s4668_s11, 32, %s6744_s0, [#allocation4]  }
0x1249   : > { %5817 = dma.done.wait (%p5562_p6), [#allocation4], 32  }
0x124a   : > { %5819 = vsyncadd (%p5562_p6), [#allocation4], 4294967264 }
0x124b PF: > { %s6745_s28 = sld [smem:[#allocation6_spill]] }
0x1251   : > { %s32_s2 = sadd.s32 1, %s6745_s28  }
0x1252   : > { %p29_p5 = scmp.ge.s32.totalorder %s32_s2, 4  }
0x1254   :  { %31 = sbr.rel (!%p29_p5) target bundleno = 14 (0xe), region = 184 }
0x125b   :  { %4680 = vsyncpa [#allocation4], 1 }
0x125c   :  { %4682 = vsyncpa [#allocation4 + $0x1], 1 }

</bundles_post_ra>
